<compile_context>
chip_gen: v6e
topology: v6e:2x2x1
jax: 0.10.0
libtpu: 0.0.40
codegen_flags: <defaults>
</compile_context>

<pallas_src>
import functools

import jax
import jax.numpy as jnp
from jax import lax
from jax.experimental import pallas as pl
from jax.experimental.pallas import tpu as pltpu


# ----------------------------------------------------------------------------- helpers

def _round_up(v, m):
    return ((v + m - 1) // m) * m


def _slab_bytes(rows, lanes, itemsize):
    """(8, 128)-tiled VMEM footprint of a 2-D slab (minor dim padded to 128 lanes)."""
    return _round_up(max(int(rows), 1), 8) * _round_up(max(int(lanes), 1), 128) * int(itemsize)


def _vmem_capacity_bytes():
    """Per-core VMEM capacity (generation-aware: ~64 MiB on v7x, ~128 MiB on v5e/v6e)."""
    try:
        return int(pltpu.get_tpu_info().vmem_capacity_bytes)
    except Exception:
        return 128 << 20


def _estimate_vmem_bytes(N, E, H, D, TQ, cd_b, out_b, exp_b):
    """VMEM budget incl. 128-lane minor-dim padding of the head-major buffers and the
    live softmax / projection temporaries (previous version under-counted these)."""
    t = _slab_bytes
    est = 0
    est += 2 * t(N, E, cd_b)                    # x block (double-buffered, resident over qi)
    est += 2 * t(TQ, E, out_b)                  # output block (double-buffered)
    est += 3 * H * t(E, D, cd_b)                # Wq/Wk/Wv head-major (single-buffered)
    est += H * t(D, E, cd_b)                    # Wp head-major
    est += 3 * H * t(1, D, 4) + t(1, E, 4)      # biases (f32)
    est += 2 * H * t(N, D, cd_b)                # K/V scratch (minor dim lane-padded!)
    est += t(TQ, N, 4 + exp_b + cd_b)           # energy (f32) + e + att for one head
    est += t(TQ, E, 4 + cd_b) + t(TQ, E, 4)     # x_q / q tile + f32 projection accumulator
    est += 2 * t(TQ, D, 4 + cd_b)               # q_h / out_h temporaries
    est += t(N, D, 4)                           # qi==0 f32 K/V projection temp (one head)
    return est


def _pick_q_tile(N, E, H, D, cd_b, out_b, exp_b, vmem_cap):
    """Generation-aware query tile: largest of {512, 256, 128, 64} whose budget fits in
    ~45% of per-core VMEM -> bigger tiles on v5e/v6e (128 MiB), smaller on v7x (64 MiB)."""
    if N <= 256:
        return N
    candidates = [t for t in (512, 256, 128, 64) if N % t == 0]
    if not candidates:
        return N
    budget = int(0.45 * vmem_cap)
    for t in candidates:                        # largest first: fewer ~0.35us grid steps
        if _estimate_vmem_bytes(N, E, H, D, t, cd_b, out_b, exp_b) <= budget:
            return t
    return candidates[-1]


def _const_block_spec(shape):
    """Constant-index (weight/bias) block: same block every grid step, so request
    single buffering -- double-buffering it would only waste VMEM."""
    n = len(shape)

    def index_map(b, qi):
        return (0,) * n

    if hasattr(pl, "Buffered"):
        try:
            return pl.BlockSpec(shape, index_map, pipeline_mode=pl.Buffered(1))
        except TypeError:                       # older jax without pipeline_mode=
            pass
    return pl.BlockSpec(shape, index_map)


# ----------------------------------------------------------------------------- kernel

def _mha_kernel(x_ref, wq_ref, bq_ref, wk_ref, bk_ref, wv_ref, bv_ref,
                wp_ref, bp_ref, o_ref, k_s, v_s, *,
                num_heads, q_tile, exp_dtype):
    """Grid step = (batch element b, query tile qi).

    x_ref:            (1, N, E)  compute-dtype, resident across qi
    wq/wk/wv_ref:     (H, E, D)  head-major, pre-transposed (1/sqrt(E) folded into Wq/bq)
    bq/bk/bv_ref:     (H, 1, D)  f32
    wp_ref:           (H, D, E)  head-major, pre-transposed projection weight
    bp_ref:           (1, E)     f32
    o_ref:            (1, TQ, E) output tile
    k_s / v_s:        (H, N, D)  VMEM scratch, persistent across query tiles
    """
    H, TQ = num_heads, q_tile
    cd = k_s.dtype
    qi = pl.program_id(1)

    # ---- Once per batch element: K/V projection into head-major resident scratch.
    # Per-head matmuls against host-pre-split weights: no lane-misaligned slicing of a
    # fused (N, 3E) value, no per-head XLU shuffles, and no Q scratch (Q is per tile).
    @pl.when(qi == 0)
    def _():
        x_all = x_ref[0]                                                      # (N, E)
        for h in range(H):                                                    # static unroll
            k_h = jnp.dot(x_all, wk_ref[h],
                          preferred_element_type=jnp.float32) + bk_ref[h]     # (N, D) f32
            v_h = jnp.dot(x_all, wv_ref[h],
                          preferred_element_type=jnp.float32) + bv_ref[h]
            k_s[h] = k_h.astype(cd)
            v_s[h] = v_h.astype(cd)

    # ---- Per query tile: project Q for this tile only, attend per head against the
    # resident K/V, and accumulate the output projection over heads.
    q_start = pl.multiple_of(qi * TQ, TQ)
    x_q = x_ref[0, pl.ds(q_start, TQ), :]                                     # (TQ, E)

    proj = None
    for h in range(H):                                                        # static unroll
        # 1/sqrt(emb_size) softmax scale is already folded into Wq/bq on the host.
        q_h = (jnp.dot(x_q, wq_ref[h], preferred_element_type=jnp.float32)
               + bq_ref[h]).astype(cd)                                        # (TQ, D)
        k_h = k_s[h]                                                          # (N, D)
        v_h = v_s[h]                                                          # (N, D)

        # energy[q, k] = sum_d q[q, d] * k[k, d]
        energy = lax.dot_general(q_h, k_h, (((1,), (1,)), ((), ())),
                                 preferred_element_type=jnp.float32)          # (TQ, N) f32

        m = jnp.max(energy, axis=-1, keepdims=True)
        e = jnp.exp((energy - m).astype(exp_dtype))       # bf16 exp on v6e/v7x (EUP); f32 on v5e
        denom = jnp.sum(e, axis=-1, keepdims=True, dtype=jnp.float32)         # f32 row sum
        inv = pl.reciprocal(denom, approx=True)                               # EUP reciprocal
        att = (e * inv.astype(e.dtype)).astype(cd)                            # (TQ, N)
        # att_drop: identity in eval mode.

        out_h = jnp.dot(att, v_h, preferred_element_type=jnp.float32)         # (TQ, D) f32

        # projection: concat_h(out_h) @ Wp  ==  sum_h out_h @ Wp[h]   (no (H,TQ,E) temp)
        p_h = jnp.dot(out_h.astype(cd), wp_ref[h],
                      preferred_element_type=jnp.float32)                     # (TQ, E) f32
        proj = p_h if proj is None else proj + p_h

    o_ref[0] = (proj + bp_ref[...]).astype(o_ref.dtype)


# ----------------------------------------------------------------------------- wrapper

def prepare_mha_params(params, *, num_heads, compute_dtype=jnp.bfloat16):
    """Host-side, once-per-model weight prep (torch nn.Linear W is (out, in)):
    pre-transpose, split heads into the weight layout, and fold the 1/sqrt(emb_size)
    softmax scale into Wq/bq.  Call this at parameter-load time, not per forward."""
    E = params["wq"].shape[0]
    H = num_heads
    assert E % H == 0, "emb_size must be divisible by num_heads"
    D = E // H
    cd = jnp.dtype(compute_dtype)
    # NOTE: the TTS_GAN module scales energy by sqrt(emb_size), NOT sqrt(head_dim).
    scaling = float(E) ** 0.5

    def head_major(w):                              # (out, in) -> (H, E_in, D)
        return jnp.transpose(w.T.reshape(E, H, D), (1, 0, 2))

    return {
        "wq": (head_major(params["wq"]) / scaling).astype(cd),
        "bq": (params["bq"] / scaling).reshape(H, 1, D).astype(jnp.float32),
        "wk": head_major(params["wk"]).astype(cd),
        "bk": params["bk"].reshape(H, 1, D).astype(jnp.float32),
        "wv": head_major(params["wv"]).astype(cd),
        "bv": params["bv"].reshape(H, 1, D).astype(jnp.float32),
        "wp": params["wp"].T.reshape(H, D, E).astype(cd),   # head-major, pre-transposed
        "bp": params["bp"].reshape(1, E).astype(jnp.float32),
    }


def multi_head_attention(x, prepared, *, q_tile=None, exp_dtype=jnp.bfloat16):
    """x: (B, N, E).  prepared: output of prepare_mha_params.
    exp_dtype: bfloat16 (default, v6e/v7x EUP) or float32 (recommended on v5e)."""
    B, N, E = x.shape
    H, E_w, D = prepared["wq"].shape
    assert E == E_w and E == H * D, "x embedding dim must match prepared params"

    cd = jnp.dtype(prepared["wq"].dtype)
    out_dtype = x.dtype
    cd_b = cd.itemsize
    out_b = jnp.dtype(out_dtype).itemsize
    exp_b = jnp.dtype(exp_dtype).itemsize

    cap = _vmem_capacity_bytes()
    if q_tile is None:
        q_tile = _pick_q_tile(N, E, H, D, cd_b, out_b, exp_b, cap)
    if q_tile != N and (N % q_tile != 0 or q_tile % 8 != 0):
        q_tile = N                                   # fall back to one full-sequence tile
    NQ = N // q_tile

    est = _estimate_vmem_bytes(N, E, H, D, q_tile, cd_b, out_b, exp_b)
    vmem_limit = int(min(max(32 << 20, 2 * est), int(0.9 * cap)))

    kernel = functools.partial(_mha_kernel, num_heads=H, q_tile=q_tile,
                               exp_dtype=jnp.dtype(exp_dtype))

    grid_spec = pltpu.PrefetchScalarGridSpec(
        num_scalar_prefetch=0,
        grid=(B, NQ),
        in_specs=[
            # x: full sequence, resident across the query tiles of one batch element.
            pl.BlockSpec((1, N, E), lambda b, qi: (b, 0, 0)),
            _const_block_spec((H, E, D)),   # Wq (head-major, scale folded)
            _const_block_spec((H, 1, D)),   # bq
            _const_block_spec((H, E, D)),   # Wk
            _const_block_spec((H, 1, D)),   # bk
            _const_block_spec((H, E, D)),   # Wv
            _const_block_spec((H, 1, D)),   # bv
            _const_block_spec((H, D, E)),   # Wp (head-major)
            _const_block_spec((1, E)),      # bp
        ],
        out_specs=pl.BlockSpec((1, q_tile, E), lambda b, qi: (b, qi, 0)),
        scratch_shapes=[pltpu.VMEM((H, N, D), cd),      # K scratch (persistent over qi)
                        pltpu.VMEM((H, N, D), cd)],     # V scratch
    )

    return pl.pallas_call(
        kernel,
        out_shape=jax.ShapeDtypeStruct((B, N, E), out_dtype),
        grid_spec=grid_spec,
        compiler_params=pltpu.CompilerParams(
            dimension_semantics=("parallel", "arbitrary"),
            vmem_limit_bytes=vmem_limit),
    )(x.astype(cd), prepared["wq"], prepared["bq"], prepared["wk"], prepared["bk"],
      prepared["wv"], prepared["bv"], prepared["wp"], prepared["bp"])


# ----------------------------------------------------------------------------- reference

def _reference(x, params, *, num_heads):
    """Pure-JAX f32 reference mirroring the PyTorch forward (eval mode)."""
    B, N, E = x.shape
    D = E // num_heads

    def linear(z, w, b):
        return jnp.einsum("bne,oe->bno", z, w) + b

    q = linear(x, params["wq"], params["bq"]).reshape(B, N, num_heads, D).transpose(0, 2, 1, 3)
    k = linear(x, params["wk"], params["bk"]).reshape(B, N, num_heads, D).transpose(0, 2, 1, 3)
    v = linear(x, params["wv"], params["bv"]).reshape(B, N, num_heads, D).transpose(0, 2, 1, 3)

    energy = jnp.einsum("bhqd,bhkd->bhqk", q, k)
    att = jax.nn.softmax(energy / (E ** 0.5), axis=-1)
    out = jnp.einsum("bhal,bhlv->bhav", att, v)
    out = out.transpose(0, 2, 1, 3).reshape(B, N, E)
    return linear(out, params["wp"], params["bp"])


if __name__ == "__main__":
    # Small shapes consistent with the module: batch=2, seq=8, emb_size=32, heads=4.
    B, N, E, H = 2, 8, 32, 4
    key = jax.random.PRNGKey(0)
    keys = jax.random.split(key, 9)

    # torch.nn.Linear-style params: W = (out, in), b = (out,).
    scale = 1.0 / (E ** 0.5)
    params = {
        "wq": jax.random.uniform(keys[0], (E, E), jnp.float32, -scale, scale),
        "bq": jax.random.uniform(keys[1], (E,), jnp.float32, -scale, scale),
        "wk": jax.random.uniform(keys[2], (E, E), jnp.float32, -scale, scale),
        "bk": jax.random.uniform(keys[3], (E,), jnp.float32, -scale, scale),
        "wv": jax.random.uniform(keys[4], (E, E), jnp.float32, -scale, scale),
        "bv": jax.random.uniform(keys[5], (E,), jnp.float32, -scale, scale),
        "wp": jax.random.uniform(keys[6], (E, E), jnp.float32, -scale, scale),
        "bp": jax.random.uniform(keys[7], (E,), jnp.float32, -scale, scale),
    }
    x = jax.random.normal(keys[8], (B, N, E), jnp.float32)

    prepared = prepare_mha_params(params, num_heads=H)      # host-side, once per model
    out = multi_head_attention(x, prepared)
    out = jax.block_until_ready(out)

    ref = _reference(x, params, num_heads=H)
    assert out.shape == (B, N, E)
    # bf16 matmul operands (f32 accumulation), bf16 exp + approx softmax reciprocal
    # -> relaxed tolerance (acceptable for GAN inference, see header notes).
    assert jnp.allclose(out, ref, atol=3e-2, rtol=3e-2), "mismatch vs reference"

    print("KERNEL_OK")
</pallas_src>

<mosaic_0001>
module attributes {stable_mosaic.version = 11 : i64} {
  func.func @_mha_kernel(%arg0: i32, %arg1: i32, %arg2: memref<1x8x32xbf16, #tpu.memory_space<vmem>>, %arg3: memref<4x32x8xbf16, #tpu.memory_space<vmem>>, %arg4: memref<4x1x8xf32, #tpu.memory_space<vmem>>, %arg5: memref<4x32x8xbf16, #tpu.memory_space<vmem>>, %arg6: memref<4x1x8xf32, #tpu.memory_space<vmem>>, %arg7: memref<4x32x8xbf16, #tpu.memory_space<vmem>>, %arg8: memref<4x1x8xf32, #tpu.memory_space<vmem>>, %arg9: memref<4x8x32xbf16, #tpu.memory_space<vmem>>, %arg10: memref<1x32xf32, #tpu.memory_space<vmem>>, %arg11: memref<1x8x32xf32, #tpu.memory_space<vmem>>, %arg12: memref<4x8x8xbf16, #tpu.memory_space<vmem>>, %arg13: memref<4x8x8xbf16, #tpu.memory_space<vmem>>) attributes {dimension_semantics = [#tpu.dimension_semantics<parallel>, #tpu.dimension_semantics<arbitrary>], iteration_bounds = array<i64: 2, 1>, scalar_prefetch = 0 : i64, scratch_operands = 2 : i64, tpu.core_type = #tpu.core_type<tc>, window_params = [{transform_indices = @transform_0, window_bounds = array<i64: 1, 8, 32>}, {pipeline_mode = #tpu.pipeline_mode<synchronous>, transform_indices = @transform_1, window_bounds = array<i64: 4, 32, 8>}, {pipeline_mode = #tpu.pipeline_mode<synchronous>, transform_indices = @transform_2, window_bounds = array<i64: 4, 1, 8>}, {pipeline_mode = #tpu.pipeline_mode<synchronous>, transform_indices = @transform_3, window_bounds = array<i64: 4, 32, 8>}, {pipeline_mode = #tpu.pipeline_mode<synchronous>, transform_indices = @transform_4, window_bounds = array<i64: 4, 1, 8>}, {pipeline_mode = #tpu.pipeline_mode<synchronous>, transform_indices = @transform_5, window_bounds = array<i64: 4, 32, 8>}, {pipeline_mode = #tpu.pipeline_mode<synchronous>, transform_indices = @transform_6, window_bounds = array<i64: 4, 1, 8>}, {pipeline_mode = #tpu.pipeline_mode<synchronous>, transform_indices = @transform_7, window_bounds = array<i64: 4, 8, 32>}, {pipeline_mode = #tpu.pipeline_mode<synchronous>, transform_indices = @transform_8, window_bounds = array<i64: 1, 32>}, {transform_indices = @transform_9, window_bounds = array<i64: 1, 8, 32>}]} {
    %c0_i32 = arith.constant 0 : i32
    %0 = arith.cmpi eq, %arg1, %c0_i32 : i32
    %1 = arith.extui %0 : i1 to i32
    %c0_i32_0 = arith.constant 0 : i32
    %2 = arith.cmpi ne, %1, %c0_i32_0 : i32
    scf.if %2 {
      %c0_87 = arith.constant 0 : index
      %c0_88 = arith.constant 0 : index
      %c0_89 = arith.constant 0 : index
      %141 = vector.load %arg2[%c0_87, %c0_88, %c0_89] : memref<1x8x32xbf16, #tpu.memory_space<vmem>>, vector<1x8x32xbf16>
      %142 = vector.shape_cast %141 : vector<1x8x32xbf16> to vector<8x32xbf16>
      %c0_90 = arith.constant 0 : index
      %c0_91 = arith.constant 0 : index
      %c0_92 = arith.constant 0 : index
      %143 = vector.load %arg5[%c0_90, %c0_91, %c0_92] : memref<4x32x8xbf16, #tpu.memory_space<vmem>>, vector<1x32x8xbf16>
      %144 = vector.shape_cast %143 : vector<1x32x8xbf16> to vector<32x8xbf16>
      %cst_93 = arith.constant dense<0.000000e+00> : vector<8x8xf32>
      %145 = tpu.matmul %142, %144, %cst_93 {dimension_numbers = #tpu.dot_dimension_numbers<[1], [0], [0], [1], [0, 0, 1, 1], [], []>} : vector<8x32xbf16>, vector<32x8xbf16>, vector<8x8xf32> -> vector<8x8xf32>
      %c0_94 = arith.constant 0 : index
      %c0_95 = arith.constant 0 : index
      %c0_96 = arith.constant 0 : index
      %146 = vector.load %arg6[%c0_94, %c0_95, %c0_96] : memref<4x1x8xf32, #tpu.memory_space<vmem>>, vector<1x1x8xf32>
      %147 = vector.shape_cast %146 : vector<1x1x8xf32> to vector<1x8xf32>
      %148 = vector.broadcast %147 : vector<1x8xf32> to vector<8x8xf32>
      %149 = arith.addf %145, %148 : vector<8x8xf32>
      %c0_97 = arith.constant 0 : index
      %c0_98 = arith.constant 0 : index
      %c0_99 = arith.constant 0 : index
      %150 = vector.load %arg7[%c0_97, %c0_98, %c0_99] : memref<4x32x8xbf16, #tpu.memory_space<vmem>>, vector<1x32x8xbf16>
      %151 = vector.shape_cast %150 : vector<1x32x8xbf16> to vector<32x8xbf16>
      %cst_100 = arith.constant dense<0.000000e+00> : vector<8x8xf32>
      %152 = tpu.matmul %142, %151, %cst_100 {dimension_numbers = #tpu.dot_dimension_numbers<[1], [0], [0], [1], [0, 0, 1, 1], [], []>} : vector<8x32xbf16>, vector<32x8xbf16>, vector<8x8xf32> -> vector<8x8xf32>
      %c0_101 = arith.constant 0 : index
      %c0_102 = arith.constant 0 : index
      %c0_103 = arith.constant 0 : index
      %153 = vector.load %arg8[%c0_101, %c0_102, %c0_103] : memref<4x1x8xf32, #tpu.memory_space<vmem>>, vector<1x1x8xf32>
      %154 = vector.shape_cast %153 : vector<1x1x8xf32> to vector<1x8xf32>
      %155 = vector.broadcast %154 : vector<1x8xf32> to vector<8x8xf32>
      %156 = arith.addf %152, %155 : vector<8x8xf32>
      %157 = arith.truncf %149 : vector<8x8xf32> to vector<8x8xbf16>
      %c0_104 = arith.constant 0 : index
      %c0_105 = arith.constant 0 : index
      %c0_106 = arith.constant 0 : index
      %158 = vector.load %arg12[%c0_104, %c0_105, %c0_106] : memref<4x8x8xbf16, #tpu.memory_space<vmem>>, vector<1x8x8xbf16>
      %159 = vector.shape_cast %158 : vector<1x8x8xbf16> to vector<8x8xbf16>
      %160 = vector.shape_cast %157 : vector<8x8xbf16> to vector<1x8x8xbf16>
      tpu.vector_store %arg12[%c0_104, %c0_105, %c0_106], %160 {strides = array<i32>} : memref<4x8x8xbf16, #tpu.memory_space<vmem>>, vector<1x8x8xbf16>,
      %161 = arith.truncf %156 : vector<8x8xf32> to vector<8x8xbf16>
      %c0_107 = arith.constant 0 : index
      %c0_108 = arith.constant 0 : index
      %c0_109 = arith.constant 0 : index
      %162 = vector.load %arg13[%c0_107, %c0_108, %c0_109] : memref<4x8x8xbf16, #tpu.memory_space<vmem>>, vector<1x8x8xbf16>
      %163 = vector.shape_cast %162 : vector<1x8x8xbf16> to vector<8x8xbf16>
      %164 = vector.shape_cast %161 : vector<8x8xbf16> to vector<1x8x8xbf16>
      tpu.vector_store %arg13[%c0_107, %c0_108, %c0_109], %164 {strides = array<i32>} : memref<4x8x8xbf16, #tpu.memory_space<vmem>>, vector<1x8x8xbf16>,
      %c1_110 = arith.constant 1 : index
      %c0_111 = arith.constant 0 : index
      %c0_112 = arith.constant 0 : index
      %165 = vector.load %arg5[%c1_110, %c0_111, %c0_112] : memref<4x32x8xbf16, #tpu.memory_space<vmem>>, vector<1x32x8xbf16>
      %166 = vector.shape_cast %165 : vector<1x32x8xbf16> to vector<32x8xbf16>
      %cst_113 = arith.constant dense<0.000000e+00> : vector<8x8xf32>
      %167 = tpu.matmul %142, %166, %cst_113 {dimension_numbers = #tpu.dot_dimension_numbers<[1], [0], [0], [1], [0, 0, 1, 1], [], []>} : vector<8x32xbf16>, vector<32x8xbf16>, vector<8x8xf32> -> vector<8x8xf32>
      %c1_114 = arith.constant 1 : index
      %c0_115 = arith.constant 0 : index
      %c0_116 = arith.constant 0 : index
      %168 = vector.load %arg6[%c1_114, %c0_115, %c0_116] : memref<4x1x8xf32, #tpu.memory_space<vmem>>, vector<1x1x8xf32>
      %169 = vector.shape_cast %168 : vector<1x1x8xf32> to vector<1x8xf32>
      %170 = vector.broadcast %169 : vector<1x8xf32> to vector<8x8xf32>
      %171 = arith.addf %167, %170 : vector<8x8xf32>
      %c1_117 = arith.constant 1 : index
      %c0_118 = arith.constant 0 : index
      %c0_119 = arith.constant 0 : index
      %172 = vector.load %arg7[%c1_117, %c0_118, %c0_119] : memref<4x32x8xbf16, #tpu.memory_space<vmem>>, vector<1x32x8xbf16>
      %173 = vector.shape_cast %172 : vector<1x32x8xbf16> to vector<32x8xbf16>
      %cst_120 = arith.constant dense<0.000000e+00> : vector<8x8xf32>
      %174 = tpu.matmul %142, %173, %cst_120 {dimension_numbers = #tpu.dot_dimension_numbers<[1], [0], [0], [1], [0, 0, 1, 1], [], []>} : vector<8x32xbf16>, vector<32x8xbf16>, vector<8x8xf32> -> vector<8x8xf32>
      %c1_121 = arith.constant 1 : index
      %c0_122 = arith.constant 0 : index
      %c0_123 = arith.constant 0 : index
      %175 = vector.load %arg8[%c1_121, %c0_122, %c0_123] : memref<4x1x8xf32, #tpu.memory_space<vmem>>, vector<1x1x8xf32>
      %176 = vector.shape_cast %175 : vector<1x1x8xf32> to vector<1x8xf32>
      %177 = vector.broadcast %176 : vector<1x8xf32> to vector<8x8xf32>
      %178 = arith.addf %174, %177 : vector<8x8xf32>
      %179 = arith.truncf %171 : vector<8x8xf32> to vector<8x8xbf16>
      %c1_124 = arith.constant 1 : index
      %c0_125 = arith.constant 0 : index
      %c0_126 = arith.constant 0 : index
      %180 = vector.load %arg12[%c1_124, %c0_125, %c0_126] : memref<4x8x8xbf16, #tpu.memory_space<vmem>>, vector<1x8x8xbf16>
      %181 = vector.shape_cast %180 : vector<1x8x8xbf16> to vector<8x8xbf16>
      %182 = vector.shape_cast %179 : vector<8x8xbf16> to vector<1x8x8xbf16>
      tpu.vector_store %arg12[%c1_124, %c0_125, %c0_126], %182 {strides = array<i32>} : memref<4x8x8xbf16, #tpu.memory_space<vmem>>, vector<1x8x8xbf16>,
      %183 = arith.truncf %178 : vector<8x8xf32> to vector<8x8xbf16>
      %c1_127 = arith.constant 1 : index
      %c0_128 = arith.constant 0 : index
      %c0_129 = arith.constant 0 : index
      %184 = vector.load %arg13[%c1_127, %c0_128, %c0_129] : memref<4x8x8xbf16, #tpu.memory_space<vmem>>, vector<1x8x8xbf16>
      %185 = vector.shape_cast %184 : vector<1x8x8xbf16> to vector<8x8xbf16>
      %186 = vector.shape_cast %183 : vector<8x8xbf16> to vector<1x8x8xbf16>
      tpu.vector_store %arg13[%c1_127, %c0_128, %c0_129], %186 {strides = array<i32>} : memref<4x8x8xbf16, #tpu.memory_space<vmem>>, vector<1x8x8xbf16>,
      %c2_130 = arith.constant 2 : index
      %c0_131 = arith.constant 0 : index
      %c0_132 = arith.constant 0 : index
      %187 = vector.load %arg5[%c2_130, %c0_131, %c0_132] : memref<4x32x8xbf16, #tpu.memory_space<vmem>>, vector<1x32x8xbf16>
      %188 = vector.shape_cast %187 : vector<1x32x8xbf16> to vector<32x8xbf16>
      %cst_133 = arith.constant dense<0.000000e+00> : vector<8x8xf32>
      %189 = tpu.matmul %142, %188, %cst_133 {dimension_numbers = #tpu.dot_dimension_numbers<[1], [0], [0], [1], [0, 0, 1, 1], [], []>} : vector<8x32xbf16>, vector<32x8xbf16>, vector<8x8xf32> -> vector<8x8xf32>
      %c2_134 = arith.constant 2 : index
      %c0_135 = arith.constant 0 : index
      %c0_136 = arith.constant 0 : index
      %190 = vector.load %arg6[%c2_134, %c0_135, %c0_136] : memref<4x1x8xf32, #tpu.memory_space<vmem>>, vector<1x1x8xf32>
      %191 = vector.shape_cast %190 : vector<1x1x8xf32> to vector<1x8xf32>
      %192 = vector.broadcast %191 : vector<1x8xf32> to vector<8x8xf32>
      %193 = arith.addf %189, %192 : vector<8x8xf32>
      %c2_137 = arith.constant 2 : index
      %c0_138 = arith.constant 0 : index
      %c0_139 = arith.constant 0 : index
      %194 = vector.load %arg7[%c2_137, %c0_138, %c0_139] : memref<4x32x8xbf16, #tpu.memory_space<vmem>>, vector<1x32x8xbf16>
      %195 = vector.shape_cast %194 : vector<1x32x8xbf16> to vector<32x8xbf16>
      %cst_140 = arith.constant dense<0.000000e+00> : vector<8x8xf32>
      %196 = tpu.matmul %142, %195, %cst_140 {dimension_numbers = #tpu.dot_dimension_numbers<[1], [0], [0], [1], [0, 0, 1, 1], [], []>} : vector<8x32xbf16>, vector<32x8xbf16>, vector<8x8xf32> -> vector<8x8xf32>
      %c2_141 = arith.constant 2 : index
      %c0_142 = arith.constant 0 : index
      %c0_143 = arith.constant 0 : index
      %197 = vector.load %arg8[%c2_141, %c0_142, %c0_143] : memref<4x1x8xf32, #tpu.memory_space<vmem>>, vector<1x1x8xf32>
      %198 = vector.shape_cast %197 : vector<1x1x8xf32> to vector<1x8xf32>
      %199 = vector.broadcast %198 : vector<1x8xf32> to vector<8x8xf32>
      %200 = arith.addf %196, %199 : vector<8x8xf32>
      %201 = arith.truncf %193 : vector<8x8xf32> to vector<8x8xbf16>
      %c2_144 = arith.constant 2 : index
      %c0_145 = arith.constant 0 : index
      %c0_146 = arith.constant 0 : index
      %202 = vector.load %arg12[%c2_144, %c0_145, %c0_146] : memref<4x8x8xbf16, #tpu.memory_space<vmem>>, vector<1x8x8xbf16>
      %203 = vector.shape_cast %202 : vector<1x8x8xbf16> to vector<8x8xbf16>
      %204 = vector.shape_cast %201 : vector<8x8xbf16> to vector<1x8x8xbf16>
      tpu.vector_store %arg12[%c2_144, %c0_145, %c0_146], %204 {strides = array<i32>} : memref<4x8x8xbf16, #tpu.memory_space<vmem>>, vector<1x8x8xbf16>,
      %205 = arith.truncf %200 : vector<8x8xf32> to vector<8x8xbf16>
      %c2_147 = arith.constant 2 : index
      %c0_148 = arith.constant 0 : index
      %c0_149 = arith.constant 0 : index
      %206 = vector.load %arg13[%c2_147, %c0_148, %c0_149] : memref<4x8x8xbf16, #tpu.memory_space<vmem>>, vector<1x8x8xbf16>
      %207 = vector.shape_cast %206 : vector<1x8x8xbf16> to vector<8x8xbf16>
      %208 = vector.shape_cast %205 : vector<8x8xbf16> to vector<1x8x8xbf16>
      tpu.vector_store %arg13[%c2_147, %c0_148, %c0_149], %208 {strides = array<i32>} : memref<4x8x8xbf16, #tpu.memory_space<vmem>>, vector<1x8x8xbf16>,
      %c3_150 = arith.constant 3 : index
      %c0_151 = arith.constant 0 : index
      %c0_152 = arith.constant 0 : index
      %209 = vector.load %arg5[%c3_150, %c0_151, %c0_152] : memref<4x32x8xbf16, #tpu.memory_space<vmem>>, vector<1x32x8xbf16>
      %210 = vector.shape_cast %209 : vector<1x32x8xbf16> to vector<32x8xbf16>
      %cst_153 = arith.constant dense<0.000000e+00> : vector<8x8xf32>
      %211 = tpu.matmul %142, %210, %cst_153 {dimension_numbers = #tpu.dot_dimension_numbers<[1], [0], [0], [1], [0, 0, 1, 1], [], []>} : vector<8x32xbf16>, vector<32x8xbf16>, vector<8x8xf32> -> vector<8x8xf32>
      %c3_154 = arith.constant 3 : index
      %c0_155 = arith.constant 0 : index
      %c0_156 = arith.constant 0 : index
      %212 = vector.load %arg6[%c3_154, %c0_155, %c0_156] : memref<4x1x8xf32, #tpu.memory_space<vmem>>, vector<1x1x8xf32>
      %213 = vector.shape_cast %212 : vector<1x1x8xf32> to vector<1x8xf32>
      %214 = vector.broadcast %213 : vector<1x8xf32> to vector<8x8xf32>
      %215 = arith.addf %211, %214 : vector<8x8xf32>
      %c3_157 = arith.constant 3 : index
      %c0_158 = arith.constant 0 : index
      %c0_159 = arith.constant 0 : index
      %216 = vector.load %arg7[%c3_157, %c0_158, %c0_159] : memref<4x32x8xbf16, #tpu.memory_space<vmem>>, vector<1x32x8xbf16>
      %217 = vector.shape_cast %216 : vector<1x32x8xbf16> to vector<32x8xbf16>
      %cst_160 = arith.constant dense<0.000000e+00> : vector<8x8xf32>
      %218 = tpu.matmul %142, %217, %cst_160 {dimension_numbers = #tpu.dot_dimension_numbers<[1], [0], [0], [1], [0, 0, 1, 1], [], []>} : vector<8x32xbf16>, vector<32x8xbf16>, vector<8x8xf32> -> vector<8x8xf32>
      %c3_161 = arith.constant 3 : index
      %c0_162 = arith.constant 0 : index
      %c0_163 = arith.constant 0 : index
      %219 = vector.load %arg8[%c3_161, %c0_162, %c0_163] : memref<4x1x8xf32, #tpu.memory_space<vmem>>, vector<1x1x8xf32>
      %220 = vector.shape_cast %219 : vector<1x1x8xf32> to vector<1x8xf32>
      %221 = vector.broadcast %220 : vector<1x8xf32> to vector<8x8xf32>
      %222 = arith.addf %218, %221 : vector<8x8xf32>
      %223 = arith.truncf %215 : vector<8x8xf32> to vector<8x8xbf16>
      %c3_164 = arith.constant 3 : index
      %c0_165 = arith.constant 0 : index
      %c0_166 = arith.constant 0 : index
      %224 = vector.load %arg12[%c3_164, %c0_165, %c0_166] : memref<4x8x8xbf16, #tpu.memory_space<vmem>>, vector<1x8x8xbf16>
      %225 = vector.shape_cast %224 : vector<1x8x8xbf16> to vector<8x8xbf16>
      %226 = vector.shape_cast %223 : vector<8x8xbf16> to vector<1x8x8xbf16>
      tpu.vector_store %arg12[%c3_164, %c0_165, %c0_166], %226 {strides = array<i32>} : memref<4x8x8xbf16, #tpu.memory_space<vmem>>, vector<1x8x8xbf16>,
      %227 = arith.truncf %222 : vector<8x8xf32> to vector<8x8xbf16>
      %c3_167 = arith.constant 3 : index
      %c0_168 = arith.constant 0 : index
      %c0_169 = arith.constant 0 : index
      %228 = vector.load %arg13[%c3_167, %c0_168, %c0_169] : memref<4x8x8xbf16, #tpu.memory_space<vmem>>, vector<1x8x8xbf16>
      %229 = vector.shape_cast %228 : vector<1x8x8xbf16> to vector<8x8xbf16>
      %230 = vector.shape_cast %227 : vector<8x8xbf16> to vector<1x8x8xbf16>
      tpu.vector_store %arg13[%c3_167, %c0_168, %c0_169], %230 {strides = array<i32>} : memref<4x8x8xbf16, #tpu.memory_space<vmem>>, vector<1x8x8xbf16>,
    } else {
    }
    %c8_i32 = arith.constant 8 : i32
    %3 = arith.muli %arg1, %c8_i32 : i32
    %4 = tpu.assume_multiple %3, 8 : i32
    %c0 = arith.constant 0 : index
    %5 = arith.index_cast %4 : i32 to index
    %c0_1 = arith.constant 0 : index
    %6 = vector.load %arg2[%c0, %5, %c0_1] : memref<1x8x32xbf16, #tpu.memory_space<vmem>>, vector<1x8x32xbf16>
    %7 = vector.shape_cast %6 : vector<1x8x32xbf16> to vector<8x32xbf16>
    %c0_2 = arith.constant 0 : index
    %c0_3 = arith.constant 0 : index
    %c0_4 = arith.constant 0 : index
    %8 = vector.load %arg3[%c0_2, %c0_3, %c0_4] : memref<4x32x8xbf16, #tpu.memory_space<vmem>>, vector<1x32x8xbf16>
    %9 = vector.shape_cast %8 : vector<1x32x8xbf16> to vector<32x8xbf16>
    %cst = arith.constant dense<0.000000e+00> : vector<8x8xf32>
    %10 = tpu.matmul %7, %9, %cst {dimension_numbers = #tpu.dot_dimension_numbers<[1], [0], [0], [1], [0, 0, 1, 1], [], []>} : vector<8x32xbf16>, vector<32x8xbf16>, vector<8x8xf32> -> vector<8x8xf32>
    %c0_5 = arith.constant 0 : index
    %c0_6 = arith.constant 0 : index
    %c0_7 = arith.constant 0 : index
    %11 = vector.load %arg4[%c0_5, %c0_6, %c0_7] : memref<4x1x8xf32, #tpu.memory_space<vmem>>, vector<1x1x8xf32>
    %12 = vector.shape_cast %11 : vector<1x1x8xf32> to vector<1x8xf32>
    %13 = vector.broadcast %12 : vector<1x8xf32> to vector<8x8xf32>
    %14 = arith.addf %10, %13 : vector<8x8xf32>
    %15 = arith.truncf %14 : vector<8x8xf32> to vector<8x8xbf16>
    %c0_8 = arith.constant 0 : index
    %c0_9 = arith.constant 0 : index
    %c0_10 = arith.constant 0 : index
    %16 = vector.load %arg12[%c0_8, %c0_9, %c0_10] : memref<4x8x8xbf16, #tpu.memory_space<vmem>>, vector<1x8x8xbf16>
    %17 = vector.shape_cast %16 : vector<1x8x8xbf16> to vector<8x8xbf16>
    %c0_11 = arith.constant 0 : index
    %c0_12 = arith.constant 0 : index
    %c0_13 = arith.constant 0 : index
    %18 = vector.load %arg13[%c0_11, %c0_12, %c0_13] : memref<4x8x8xbf16, #tpu.memory_space<vmem>>, vector<1x8x8xbf16>
    %19 = vector.shape_cast %18 : vector<1x8x8xbf16> to vector<8x8xbf16>
    %cst_14 = arith.constant dense<0.000000e+00> : vector<8x8xf32>
    %20 = tpu.matmul %15, %17, %cst_14 {dimension_numbers = #tpu.dot_dimension_numbers<[1], [1], [0], [0], [0, 0, 1, 0], [], []>} : vector<8x8xbf16>, vector<8x8xbf16>, vector<8x8xf32> -> vector<8x8xf32>
    %cst_15 = arith.constant dense<0xFF800000> : vector<8xf32>
    %21 = vector.multi_reduction <maximumf>, %20, %cst_15 [1] : vector<8x8xf32> to vector<8xf32>
    %22 = vector.shape_cast %21 : vector<8xf32> to vector<8x1xf32>
    %23 = vector.broadcast %22 : vector<8x1xf32> to vector<8x8xf32>
    %24 = arith.subf %20, %23 : vector<8x8xf32>
    %25 = arith.truncf %24 : vector<8x8xf32> to vector<8x8xbf16>
    %26 = math.exp %25 : vector<8x8xbf16>
    %27 = arith.extf %26 : vector<8x8xbf16> to vector<8x8xf32>
    %cst_16 = arith.constant dense<0.000000e+00> : vector<8xf32>
    %28 = vector.multi_reduction <add>, %27, %cst_16 [1] : vector<8x8xf32> to vector<8xf32>
    %29 = vector.shape_cast %28 : vector<8xf32> to vector<8x1xf32>
    %30 = tpu.reciprocal %29 {approx = true} : vector<8x1xf32> -> vector<8x1xf32>
    %31 = arith.truncf %30 : vector<8x1xf32> to vector<8x1xbf16>
    %32 = vector.broadcast %31 : vector<8x1xbf16> to vector<8x8xbf16>
    %33 = arith.mulf %26, %32 : vector<8x8xbf16>
    %cst_17 = arith.constant dense<0.000000e+00> : vector<8x8xf32>
    %34 = tpu.matmul %33, %19, %cst_17 {dimension_numbers = #tpu.dot_dimension_numbers<[1], [0], [0], [1], [0, 0, 1, 1], [], []>} : vector<8x8xbf16>, vector<8x8xbf16>, vector<8x8xf32> -> vector<8x8xf32>
    %35 = arith.truncf %34 : vector<8x8xf32> to vector<8x8xbf16>
    %c0_18 = arith.constant 0 : index
    %c0_19 = arith.constant 0 : index
    %c0_20 = arith.constant 0 : index
    %36 = vector.load %arg9[%c0_18, %c0_19, %c0_20] : memref<4x8x32xbf16, #tpu.memory_space<vmem>>, vector<1x8x32xbf16>
    %37 = vector.shape_cast %36 : vector<1x8x32xbf16> to vector<8x32xbf16>
    %cst_21 = arith.constant dense<0.000000e+00> : vector<8x32xf32>
    %38 = tpu.matmul %35, %37, %cst_21 {dimension_numbers = #tpu.dot_dimension_numbers<[1], [0], [0], [1], [0, 0, 1, 1], [], []>} : vector<8x8xbf16>, vector<8x32xbf16>, vector<8x32xf32> -> vector<8x32xf32>
    %c1 = arith.constant 1 : index
    %c0_22 = arith.constant 0 : index
    %c0_23 = arith.constant 0 : index
    %39 = vector.load %arg3[%c1, %c0_22, %c0_23] : memref<4x32x8xbf16, #tpu.memory_space<vmem>>, vector<1x32x8xbf16>
    %40 = vector.shape_cast %39 : vector<1x32x8xbf16> to vector<32x8xbf16>
    %cst_24 = arith.constant dense<0.000000e+00> : vector<8x8xf32>
    %41 = tpu.matmul %7, %40, %cst_24 {dimension_numbers = #tpu.dot_dimension_numbers<[1], [0], [0], [1], [0, 0, 1, 1], [], []>} : vector<8x32xbf16>, vector<32x8xbf16>, vector<8x8xf32> -> vector<8x8xf32>
    %c1_25 = arith.constant 1 : index
    %c0_26 = arith.constant 0 : index
    %c0_27 = arith.constant 0 : index
    %42 = vector.load %arg4[%c1_25, %c0_26, %c0_27] : memref<4x1x8xf32, #tpu.memory_space<vmem>>, vector<1x1x8xf32>
    %43 = vector.shape_cast %42 : vector<1x1x8xf32> to vector<1x8xf32>
    %44 = vector.broadcast %43 : vector<1x8xf32> to vector<8x8xf32>
    %45 = arith.addf %41, %44 : vector<8x8xf32>
    %46 = arith.truncf %45 : vector<8x8xf32> to vector<8x8xbf16>
    %c1_28 = arith.constant 1 : index
    %c0_29 = arith.constant 0 : index
    %c0_30 = arith.constant 0 : index
    %47 = vector.load %arg12[%c1_28, %c0_29, %c0_30] : memref<4x8x8xbf16, #tpu.memory_space<vmem>>, vector<1x8x8xbf16>
    %48 = vector.shape_cast %47 : vector<1x8x8xbf16> to vector<8x8xbf16>
    %c1_31 = arith.constant 1 : index
    %c0_32 = arith.constant 0 : index
    %c0_33 = arith.constant 0 : index
    %49 = vector.load %arg13[%c1_31, %c0_32, %c0_33] : memref<4x8x8xbf16, #tpu.memory_space<vmem>>, vector<1x8x8xbf16>
    %50 = vector.shape_cast %49 : vector<1x8x8xbf16> to vector<8x8xbf16>
    %cst_34 = arith.constant dense<0.000000e+00> : vector<8x8xf32>
    %51 = tpu.matmul %46, %48, %cst_34 {dimension_numbers = #tpu.dot_dimension_numbers<[1], [1], [0], [0], [0, 0, 1, 0], [], []>} : vector<8x8xbf16>, vector<8x8xbf16>, vector<8x8xf32> -> vector<8x8xf32>
    %cst_35 = arith.constant dense<0xFF800000> : vector<8xf32>
    %52 = vector.multi_reduction <maximumf>, %51, %cst_35 [1] : vector<8x8xf32> to vector<8xf32>
    %53 = vector.shape_cast %52 : vector<8xf32> to vector<8x1xf32>
    %54 = vector.broadcast %53 : vector<8x1xf32> to vector<8x8xf32>
    %55 = arith.subf %51, %54 : vector<8x8xf32>
    %56 = arith.truncf %55 : vector<8x8xf32> to vector<8x8xbf16>
    %57 = math.exp %56 : vector<8x8xbf16>
    %58 = arith.extf %57 : vector<8x8xbf16> to vector<8x8xf32>
    %cst_36 = arith.constant dense<0.000000e+00> : vector<8xf32>
    %59 = vector.multi_reduction <add>, %58, %cst_36 [1] : vector<8x8xf32> to vector<8xf32>
    %60 = vector.shape_cast %59 : vector<8xf32> to vector<8x1xf32>
    %61 = tpu.reciprocal %60 {approx = true} : vector<8x1xf32> -> vector<8x1xf32>
    %62 = arith.truncf %61 : vector<8x1xf32> to vector<8x1xbf16>
    %63 = vector.broadcast %62 : vector<8x1xbf16> to vector<8x8xbf16>
    %64 = arith.mulf %57, %63 : vector<8x8xbf16>
    %cst_37 = arith.constant dense<0.000000e+00> : vector<8x8xf32>
    %65 = tpu.matmul %64, %50, %cst_37 {dimension_numbers = #tpu.dot_dimension_numbers<[1], [0], [0], [1], [0, 0, 1, 1], [], []>} : vector<8x8xbf16>, vector<8x8xbf16>, vector<8x8xf32> -> vector<8x8xf32>
    %66 = arith.truncf %65 : vector<8x8xf32> to vector<8x8xbf16>
    %c1_38 = arith.constant 1 : index
    %c0_39 = arith.constant 0 : index
    %c0_40 = arith.constant 0 : index
    %67 = vector.load %arg9[%c1_38, %c0_39, %c0_40] : memref<4x8x32xbf16, #tpu.memory_space<vmem>>, vector<1x8x32xbf16>
    %68 = vector.shape_cast %67 : vector<1x8x32xbf16> to vector<8x32xbf16>
    %cst_41 = arith.constant dense<0.000000e+00> : vector<8x32xf32>
    %69 = tpu.matmul %66, %68, %cst_41 {dimension_numbers = #tpu.dot_dimension_numbers<[1], [0], [0], [1], [0, 0, 1, 1], [], []>} : vector<8x8xbf16>, vector<8x32xbf16>, vector<8x32xf32> -> vector<8x32xf32>
    %70 = arith.addf %38, %69 : vector<8x32xf32>
    %c2 = arith.constant 2 : index
    %c0_42 = arith.constant 0 : index
    %c0_43 = arith.constant 0 : index
    %71 = vector.load %arg3[%c2, %c0_42, %c0_43] : memref<4x32x8xbf16, #tpu.memory_space<vmem>>, vector<1x32x8xbf16>
    %72 = vector.shape_cast %71 : vector<1x32x8xbf16> to vector<32x8xbf16>
    %cst_44 = arith.constant dense<0.000000e+00> : vector<8x8xf32>
    %73 = tpu.matmul %7, %72, %cst_44 {dimension_numbers = #tpu.dot_dimension_numbers<[1], [0], [0], [1], [0, 0, 1, 1], [], []>} : vector<8x32xbf16>, vector<32x8xbf16>, vector<8x8xf32> -> vector<8x8xf32>
    %c2_45 = arith.constant 2 : index
    %c0_46 = arith.constant 0 : index
    %c0_47 = arith.constant 0 : index
    %74 = vector.load %arg4[%c2_45, %c0_46, %c0_47] : memref<4x1x8xf32, #tpu.memory_space<vmem>>, vector<1x1x8xf32>
    %75 = vector.shape_cast %74 : vector<1x1x8xf32> to vector<1x8xf32>
    %76 = vector.broadcast %75 : vector<1x8xf32> to vector<8x8xf32>
    %77 = arith.addf %73, %76 : vector<8x8xf32>
    %78 = arith.truncf %77 : vector<8x8xf32> to vector<8x8xbf16>
    %c2_48 = arith.constant 2 : index
    %c0_49 = arith.constant 0 : index
    %c0_50 = arith.constant 0 : index
    %79 = vector.load %arg12[%c2_48, %c0_49, %c0_50] : memref<4x8x8xbf16, #tpu.memory_space<vmem>>, vector<1x8x8xbf16>
    %80 = vector.shape_cast %79 : vector<1x8x8xbf16> to vector<8x8xbf16>
    %c2_51 = arith.constant 2 : index
    %c0_52 = arith.constant 0 : index
    %c0_53 = arith.constant 0 : index
    %81 = vector.load %arg13[%c2_51, %c0_52, %c0_53] : memref<4x8x8xbf16, #tpu.memory_space<vmem>>, vector<1x8x8xbf16>
    %82 = vector.shape_cast %81 : vector<1x8x8xbf16> to vector<8x8xbf16>
    %cst_54 = arith.constant dense<0.000000e+00> : vector<8x8xf32>
    %83 = tpu.matmul %78, %80, %cst_54 {dimension_numbers = #tpu.dot_dimension_numbers<[1], [1], [0], [0], [0, 0, 1, 0], [], []>} : vector<8x8xbf16>, vector<8x8xbf16>, vector<8x8xf32> -> vector<8x8xf32>
    %cst_55 = arith.constant dense<0xFF800000> : vector<8xf32>
    %84 = vector.multi_reduction <maximumf>, %83, %cst_55 [1] : vector<8x8xf32> to vector<8xf32>
    %85 = vector.shape_cast %84 : vector<8xf32> to vector<8x1xf32>
    %86 = vector.broadcast %85 : vector<8x1xf32> to vector<8x8xf32>
    %87 = arith.subf %83, %86 : vector<8x8xf32>
    %88 = arith.truncf %87 : vector<8x8xf32> to vector<8x8xbf16>
    %89 = math.exp %88 : vector<8x8xbf16>
    %90 = arith.extf %89 : vector<8x8xbf16> to vector<8x8xf32>
    %cst_56 = arith.constant dense<0.000000e+00> : vector<8xf32>
    %91 = vector.multi_reduction <add>, %90, %cst_56 [1] : vector<8x8xf32> to vector<8xf32>
    %92 = vector.shape_cast %91 : vector<8xf32> to vector<8x1xf32>
    %93 = tpu.reciprocal %92 {approx = true} : vector<8x1xf32> -> vector<8x1xf32>
    %94 = arith.truncf %93 : vector<8x1xf32> to vector<8x1xbf16>
    %95 = vector.broadcast %94 : vector<8x1xbf16> to vector<8x8xbf16>
    %96 = arith.mulf %89, %95 : vector<8x8xbf16>
    %cst_57 = arith.constant dense<0.000000e+00> : vector<8x8xf32>
    %97 = tpu.matmul %96, %82, %cst_57 {dimension_numbers = #tpu.dot_dimension_numbers<[1], [0], [0], [1], [0, 0, 1, 1], [], []>} : vector<8x8xbf16>, vector<8x8xbf16>, vector<8x8xf32> -> vector<8x8xf32>
    %98 = arith.truncf %97 : vector<8x8xf32> to vector<8x8xbf16>
    %c2_58 = arith.constant 2 : index
    %c0_59 = arith.constant 0 : index
    %c0_60 = arith.constant 0 : index
    %99 = vector.load %arg9[%c2_58, %c0_59, %c0_60] : memref<4x8x32xbf16, #tpu.memory_space<vmem>>, vector<1x8x32xbf16>
    %100 = vector.shape_cast %99 : vector<1x8x32xbf16> to vector<8x32xbf16>
    %cst_61 = arith.constant dense<0.000000e+00> : vector<8x32xf32>
    %101 = tpu.matmul %98, %100, %cst_61 {dimension_numbers = #tpu.dot_dimension_numbers<[1], [0], [0], [1], [0, 0, 1, 1], [], []>} : vector<8x8xbf16>, vector<8x32xbf16>, vector<8x32xf32> -> vector<8x32xf32>
    %102 = arith.addf %70, %101 : vector<8x32xf32>
    %c3 = arith.constant 3 : index
    %c0_62 = arith.constant 0 : index
    %c0_63 = arith.constant 0 : index
    %103 = vector.load %arg3[%c3, %c0_62, %c0_63] : memref<4x32x8xbf16, #tpu.memory_space<vmem>>, vector<1x32x8xbf16>
    %104 = vector.shape_cast %103 : vector<1x32x8xbf16> to vector<32x8xbf16>
    %cst_64 = arith.constant dense<0.000000e+00> : vector<8x8xf32>
    %105 = tpu.matmul %7, %104, %cst_64 {dimension_numbers = #tpu.dot_dimension_numbers<[1], [0], [0], [1], [0, 0, 1, 1], [], []>} : vector<8x32xbf16>, vector<32x8xbf16>, vector<8x8xf32> -> vector<8x8xf32>
    %c3_65 = arith.constant 3 : index
    %c0_66 = arith.constant 0 : index
    %c0_67 = arith.constant 0 : index
    %106 = vector.load %arg4[%c3_65, %c0_66, %c0_67] : memref<4x1x8xf32, #tpu.memory_space<vmem>>, vector<1x1x8xf32>
    %107 = vector.shape_cast %106 : vector<1x1x8xf32> to vector<1x8xf32>
    %108 = vector.broadcast %107 : vector<1x8xf32> to vector<8x8xf32>
    %109 = arith.addf %105, %108 : vector<8x8xf32>
    %110 = arith.truncf %109 : vector<8x8xf32> to vector<8x8xbf16>
    %c3_68 = arith.constant 3 : index
    %c0_69 = arith.constant 0 : index
    %c0_70 = arith.constant 0 : index
    %111 = vector.load %arg12[%c3_68, %c0_69, %c0_70] : memref<4x8x8xbf16, #tpu.memory_space<vmem>>, vector<1x8x8xbf16>
    %112 = vector.shape_cast %111 : vector<1x8x8xbf16> to vector<8x8xbf16>
    %c3_71 = arith.constant 3 : index
    %c0_72 = arith.constant 0 : index
    %c0_73 = arith.constant 0 : index
    %113 = vector.load %arg13[%c3_71, %c0_72, %c0_73] : memref<4x8x8xbf16, #tpu.memory_space<vmem>>, vector<1x8x8xbf16>
    %114 = vector.shape_cast %113 : vector<1x8x8xbf16> to vector<8x8xbf16>
    %cst_74 = arith.constant dense<0.000000e+00> : vector<8x8xf32>
    %115 = tpu.matmul %110, %112, %cst_74 {dimension_numbers = #tpu.dot_dimension_numbers<[1], [1], [0], [0], [0, 0, 1, 0], [], []>} : vector<8x8xbf16>, vector<8x8xbf16>, vector<8x8xf32> -> vector<8x8xf32>
    %cst_75 = arith.constant dense<0xFF800000> : vector<8xf32>
    %116 = vector.multi_reduction <maximumf>, %115, %cst_75 [1] : vector<8x8xf32> to vector<8xf32>
    %117 = vector.shape_cast %116 : vector<8xf32> to vector<8x1xf32>
    %118 = vector.broadcast %117 : vector<8x1xf32> to vector<8x8xf32>
    %119 = arith.subf %115, %118 : vector<8x8xf32>
    %120 = arith.truncf %119 : vector<8x8xf32> to vector<8x8xbf16>
    %121 = math.exp %120 : vector<8x8xbf16>
    %122 = arith.extf %121 : vector<8x8xbf16> to vector<8x8xf32>
    %cst_76 = arith.constant dense<0.000000e+00> : vector<8xf32>
    %123 = vector.multi_reduction <add>, %122, %cst_76 [1] : vector<8x8xf32> to vector<8xf32>
    %124 = vector.shape_cast %123 : vector<8xf32> to vector<8x1xf32>
    %125 = tpu.reciprocal %124 {approx = true} : vector<8x1xf32> -> vector<8x1xf32>
    %126 = arith.truncf %125 : vector<8x1xf32> to vector<8x1xbf16>
    %127 = vector.broadcast %126 : vector<8x1xbf16> to vector<8x8xbf16>
    %128 = arith.mulf %121, %127 : vector<8x8xbf16>
    %cst_77 = arith.constant dense<0.000000e+00> : vector<8x8xf32>
    %129 = tpu.matmul %128, %114, %cst_77 {dimension_numbers = #tpu.dot_dimension_numbers<[1], [0], [0], [1], [0, 0, 1, 1], [], []>} : vector<8x8xbf16>, vector<8x8xbf16>, vector<8x8xf32> -> vector<8x8xf32>
    %130 = arith.truncf %129 : vector<8x8xf32> to vector<8x8xbf16>
    %c3_78 = arith.constant 3 : index
    %c0_79 = arith.constant 0 : index
    %c0_80 = arith.constant 0 : index
    %131 = vector.load %arg9[%c3_78, %c0_79, %c0_80] : memref<4x8x32xbf16, #tpu.memory_space<vmem>>, vector<1x8x32xbf16>
    %132 = vector.shape_cast %131 : vector<1x8x32xbf16> to vector<8x32xbf16>
    %cst_81 = arith.constant dense<0.000000e+00> : vector<8x32xf32>
    %133 = tpu.matmul %130, %132, %cst_81 {dimension_numbers = #tpu.dot_dimension_numbers<[1], [0], [0], [1], [0, 0, 1, 1], [], []>} : vector<8x8xbf16>, vector<8x32xbf16>, vector<8x32xf32> -> vector<8x32xf32>
    %134 = arith.addf %102, %133 : vector<8x32xf32>
    %c0_82 = arith.constant 0 : index
    %c0_83 = arith.constant 0 : index
    %135 = vector.load %arg10[%c0_82, %c0_83] : memref<1x32xf32, #tpu.memory_space<vmem>>, vector<1x32xf32>
    %136 = vector.broadcast %135 : vector<1x32xf32> to vector<8x32xf32>
    %137 = arith.addf %134, %136 : vector<8x32xf32>
    %c0_84 = arith.constant 0 : index
    %c0_85 = arith.constant 0 : index
    %c0_86 = arith.constant 0 : index
    %138 = vector.load %arg11[%c0_84, %c0_85, %c0_86] : memref<1x8x32xf32, #tpu.memory_space<vmem>>, vector<1x8x32xf32>
    %139 = vector.shape_cast %138 : vector<1x8x32xf32> to vector<8x32xf32>
    %140 = vector.shape_cast %137 : vector<8x32xf32> to vector<1x8x32xf32>
    tpu.vector_store %arg11[%c0_84, %c0_85, %c0_86], %140 {strides = array<i32>} : memref<1x8x32xf32, #tpu.memory_space<vmem>>, vector<1x8x32xf32>,
    return
  }
  func.func @transform_0(%arg0: i32, %arg1: i32) -> (i32, i32, i32) {
    %c0_i32 = arith.constant 0 : i32
    %c0_i32_0 = arith.constant 0 : i32
    %c0_i32_1 = arith.constant 0 : i32
    return %arg0, %c0_i32, %c0_i32_0 : i32, i32, i32
  }
  func.func @transform_1(%arg0: i32, %arg1: i32) -> (i32, i32, i32) {
    %c0_i32 = arith.constant 0 : i32
    %c0_i32_0 = arith.constant 0 : i32
    %c0_i32_1 = arith.constant 0 : i32
    %c0_i32_2 = arith.constant 0 : i32
    return %c0_i32, %c0_i32_0, %c0_i32_1 : i32, i32, i32
  }
  func.func @transform_2(%arg0: i32, %arg1: i32) -> (i32, i32, i32) {
    %c0_i32 = arith.constant 0 : i32
    %c0_i32_0 = arith.constant 0 : i32
    %c0_i32_1 = arith.constant 0 : i32
    %c0_i32_2 = arith.constant 0 : i32
    return %c0_i32, %c0_i32_0, %c0_i32_1 : i32, i32, i32
  }
  func.func @transform_3(%arg0: i32, %arg1: i32) -> (i32, i32, i32) {
    %c0_i32 = arith.constant 0 : i32
    %c0_i32_0 = arith.constant 0 : i32
    %c0_i32_1 = arith.constant 0 : i32
    %c0_i32_2 = arith.constant 0 : i32
    return %c0_i32, %c0_i32_0, %c0_i32_1 : i32, i32, i32
  }
  func.func @transform_4(%arg0: i32, %arg1: i32) -> (i32, i32, i32) {
    %c0_i32 = arith.constant 0 : i32
    %c0_i32_0 = arith.constant 0 : i32
    %c0_i32_1 = arith.constant 0 : i32
    %c0_i32_2 = arith.constant 0 : i32
    return %c0_i32, %c0_i32_0, %c0_i32_1 : i32, i32, i32
  }
  func.func @transform_5(%arg0: i32, %arg1: i32) -> (i32, i32, i32) {
    %c0_i32 = arith.constant 0 : i32
    %c0_i32_0 = arith.constant 0 : i32
    %c0_i32_1 = arith.constant 0 : i32
    %c0_i32_2 = arith.constant 0 : i32
    return %c0_i32, %c0_i32_0, %c0_i32_1 : i32, i32, i32
  }
  func.func @transform_6(%arg0: i32, %arg1: i32) -> (i32, i32, i32) {
    %c0_i32 = arith.constant 0 : i32
    %c0_i32_0 = arith.constant 0 : i32
    %c0_i32_1 = arith.constant 0 : i32
    %c0_i32_2 = arith.constant 0 : i32
    return %c0_i32, %c0_i32_0, %c0_i32_1 : i32, i32, i32
  }
  func.func @transform_7(%arg0: i32, %arg1: i32) -> (i32, i32, i32) {
    %c0_i32 = arith.constant 0 : i32
    %c0_i32_0 = arith.constant 0 : i32
    %c0_i32_1 = arith.constant 0 : i32
    %c0_i32_2 = arith.constant 0 : i32
    return %c0_i32, %c0_i32_0, %c0_i32_1 : i32, i32, i32
  }
  func.func @transform_8(%arg0: i32, %arg1: i32) -> (i32, i32) {
    %c0_i32 = arith.constant 0 : i32
    %c0_i32_0 = arith.constant 0 : i32
    %c0_i32_1 = arith.constant 0 : i32
    return %c0_i32, %c0_i32_0 : i32, i32
  }
  func.func @transform_9(%arg0: i32, %arg1: i32) -> (i32, i32, i32) {
    %c0_i32 = arith.constant 0 : i32
    %c0_i32_0 = arith.constant 0 : i32
    return %arg0, %arg1, %c0_i32 : i32, i32, i32
  }
}

</mosaic_0001>

<bundles_post_ra>
// kernel: tpu_custom_call.1
= control target key start
LH: loop header
LB: loop body
LE: loop exit
PB: predicated region body
PF: predicated region fallthrough
CT: control target
= control target key end

     0   :  { %14 = vsyncpa [#allocation5], 0  ;;  %s2871_s0 = inlined_call_operand.vmem [shape: bf16[2,8,32], index: 0, kind: input, shape index: {}]   ;;  %s2872_s1 = inlined_call_operand.vmem [shape: bf16[4,32,8], index: 1, kind: input, shape index: {}]   ;;  %s2873_s2 = inlined_call_operand.vmem [shape: f32[4,1,8], index: 2, kind: input, shape index: {}]   ;;  %s2874_s3 = inlined_call_operand.vmem [shape: bf16[4,32,8], index: 3, kind: input, shape index: {}]   ;;  %s2875_s4 = inlined_call_operand.vmem [shape: f32[4,1,8], index: 4, kind: input, shape index: {}]   ;;  %s2876_s5 = inlined_call_operand.vmem [shape: bf16[4,32,8], index: 5, kind: input, shape index: {}]   ;;  %s2877_s6 = inlined_call_operand.vmem [shape: f32[4,1,8], index: 6, kind: input, shape index: {}]   ;;  %s2878_s7 = inlined_call_operand.vmem [shape: bf16[4,8,32], index: 7, kind: input, shape index: {}]   ;;  %s2879_s8 = inlined_call_operand.vmem [shape: f32[1,32], index: 8, kind: input, shape index: {}]   ;;  %s2880_s9 = inlined_call_operand.hbm [shape: f32[2,8,32], index: 9, kind: output, shape index: {}]  }
   0x1   :  { %16 = vsyncpa [#allocation5 + $0x1], 0  ;;  %s2474_s30 = smov 0   ;;  %s2476_s10 = smov 0  }
   0x2   :  { %s2478_s11 = smov 0   ;;  %s2480_s12 = smov 0  }
   0x3   :  { %s2482_s13 = smov 0   ;;  %s2484_s14 = smov 0  }
   0x4 LB: > { %s1898_s15 = sadd.s32 4294967295, %s2419_s14   ;;  %s1899_s16 = sadd.s32 4294967294, %s2419_s14   ;;  %s2419_s14 = sphi %s2484_s14, %s22_s14   ;;  %s2415_s13 = sphi %s2482_s13, %s2887_s13   ;;  %s2411_s12 = sphi %s2480_s12, %s2886_s12   ;;  %s2407_s11 = sphi %s2478_s11, %s2885_s11   ;;  %s2403_s10 = sphi %s2476_s10, %s2884_s10   ;;  %s2399_s30 = sphi %s2474_s30, %s2883_s30  }
   0x5   : > { %s34_s17 = sadd.s32 1, %s2415_s13  ;;  %s237_s18 = sadd.s32 1, %s2407_s11 }
   0x6   : > { %p36_p0 = scmp.ge.s32.totalorder %s34_s17, 2  ;;  %p247_p1 = scmp.ne.s32.totalorder %s2407_s11, %s2403_s10 }
   0x7   : > { %p248_p2 = scmp.eq.s32.totalorder %s1898_s15, 1  ;;  %p253_p3 = scmp.ne.s32.totalorder %s2403_s10, %s2399_s30 }
   0x8   : > { %s2889_s17 = smov (%p36_p0, %s34_s17), 0  ;;  %p254_p5 = scmp.eq.s32.totalorder %s1899_s16, 1 }
   0x9   : > { %p2514_p4 = por %p248_p2, %p247_p1  ;;  %s232_s20 = ssub.s32 %s2415_s13, %s2889_s17 }
   0xa   : > { %p1902_p6 = scmp.ge.s32.totalorder %s2419_s14, 1  ;;  %p235_p7 = scmp.eq.s32.totalorder %s232_s20, 0 }
   0xb   : > { %p2521_p8 = por %p254_p5, %p253_p3  ;;  %p303_p9 = scmp.lt.s32.totalorder %s2419_s14, 3 }
   0xc   : > { %s2527_s22 = scalar_select %p235_p7, %s2407_s11, %s237_s18  }
   0xd   : > { %p304_p10 = pnand %p1902_p6, %p303_p9 }
   0xe   : > { %p338_p11 = scmp.lt.s32.totalorder (!%p304_p10), %s2411_s12, 1  ;;  %s335_s18 = sand.u32 (!%p304_p10), 1, %s2403_s10  }
   0xf   : > { %307 = sbr.rel (%p304_p10) target bundleno = 3325 (0xcfd), region = 56  ;;  %s1903_s23 = sshll.u32 (!%p304_p10), %s335_s18, 3 }
  0x10   : > { %s2015_s26 = sshll.u32 (!%p304_p10), %s2411_s12, 7 }
  0x14   : > { %v2303_v0 = vld [vmem:[%s2874_s3 + $0x8] sm:$0xff]   ;;  %v2421_v1 = vmov 0.0   ;;  %v2304_v2 = vld [vmem:[%s2874_s3] sm:$0xff]   ;;  %vm2422_vm0 = vmmov 0   ;;  %s339_s27 = scalar_select %p338_p11, %s2411_s12, 1  ;;  %vm371_vm1 = vcmask 261120  }
  0x15   : > { %2078 = vmatprep.subr.bf16.mxu0 %v2421_v1  ;;  %2086 = vmatprep.subr.bf16.mxu1 %v2421_v1  ;;  %v2305_v3 = vld [vmem:[%s2874_s3 + $0x18] sm:$0xff]   ;;  %v2306_v5 = vld [vmem:[%s2874_s3 + $0x10] sm:$0xff]   ;;  %v2313_v6 = vld [vmem:[%s2876_s5 + $0x8] sm:$0xff]   ;;  %vm479_vm2 = vcmask 60416   ;;  %vm967_vm3 = vcmask 64512   ;;  %vm1032_vm4 = vcmask 1043456  }
  0x16   : > { %2079 = vmatpush3.bf16.msra.mxu0 %v2303_v0  ;;  %2082 = vmatprep.mubr.msk.bf16.mxu0 %vm2422_vm0, %v2421_v1  ;;  %s1904_s28 = sshll.u32 %s339_s27, 2  ;;  %v2314_v7 = vld [vmem:[%s2876_s5] sm:$0xff]   ;;  %v2307_v8 = vld [vmem:[%s2874_s3 + $0x28] sm:$0xff]   ;;  %v2315_v10 = vld [vmem:[%s2876_s5 + $0x18] sm:$0xff]   ;;  %s337_s27 = scalar_lea.vmem [#allocation4], %s1903_s23 }
  0x17   : > { %2080 = vmatprep.subr.bf16.mxu0 %v2421_v1  ;;  %2090 = vmatprep.mubr.msk.bf16.mxu1 %vm2422_vm0, %v2421_v1  ;;  %s2550_s20 = scalar_lea.vmem %s2871_s0, %s1904_s28  ;;  %v2308_v9 = vld [vmem:[%s2874_s3 + $0x20] sm:$0xff]   ;;  %v2316_v11 = vld [vmem:[%s2876_s5 + $0x10] sm:$0xff]   ;;  %v2309_v12 = vld [vmem:[%s2874_s3 + $0x38] sm:$0xff]   ;;  %s1828_s28 = sshll.u32 %s337_s27, 4  ;;  %s2826_s28 = int_to_ptr.vmem [resolvable:$true] %s1828_s28 }
  0x18   : > { %v2554_v4 = vld [vmem:[%s2550_s20] sm:$0xf]  ;;  %2087 = vmatpush3.bf16.msra.mxu1 %v2313_v6  ;;  %v2317_v13 = vld [vmem:[%s2876_s5 + $0x28] sm:$0xff]   ;;  %v2310_v14 = vld [vmem:[%s2874_s3 + $0x30] sm:$0xff]   ;;  %s1814_s12 = scalar_lea.sflag [#allocation5], %s335_s18  ;;  %s2343_s16 = scalar_lea.vmem %s2826_s28, 128 }
  0x19   : > { %2088 = vmatprep.subr.bf16.mxu1 %v2421_v1  ;;  %v2311_v15 = vld [vmem:[%s2872_s1 + $0x8] sm:$0xff]   ;;  %v2312_v16 = vld [vmem:[%s2872_s1] sm:$0xff]   ;;  %v2319_v19 = vld [vmem:[%s2876_s5 + $0x38] sm:$0xff]   ;;  %p2344_p12 = scmp.ne.s32.totalorder %s2826_s28, %s2343_s16  ;;  %s2423_s23 = smov [#allocation4]  }
  0x1a   : > { %2081 = vmatpush3.bf16.msra.mxu0 %v2304_v2  ;;  %v2629_v17 = vld [vmem:[%s2550_s20] sm:$0xf]  ;;  %v2320_v20 = vld [vmem:[%s2876_s5 + $0x30] sm:$0xff]   ;;  %s2824_s20 = scalar_lea.hbm %s2880_s9, %s2015_s26  ;;  %s2347_s24 = sshll.u32 %s2423_s23, 4  ;;  %s2348_s24 = int_to_ptr.vmem [resolvable:$false] %s2347_s24 }
  0x1b   : > { %2094 = vmatprep.subr.bf16.mxu0 %v2421_v1  ;;  %v2318_v18 = vld [vmem:[%s2876_s5 + $0x20] sm:$0xff]   ;;  %p2345_p13 = pnand %p2344_p12, %p2514_p4  ;;  %s2349_s25 = scalar_lea.vmem %s2348_s24, 256 }
  0x1c   : > { %2089 = vmatpush3.bf16.msra.mxu1 %v2314_v7  ;;  %v1905_v21 = vld [vmem:[%s2875_s4] ss:$0 sm:$0xff]  ;;  %v1918_v28 = vld [vmem:[%s2875_s4 + $0x1] ss:$0 sm:$0xff]  ;;  %v1936_v41 = vld [vmem:[%s2875_s4 + $0x2] ss:$0 sm:$0xff]  ;;  %p2350_p1 = scmp.lt.s32.totalorder %s2826_s28, %s2348_s24  ;;  %p2351_p2 = scmp.lt.s32.totalorder %s2349_s25, %s2343_s16 }
  0x1d   : > { %2083 = vmatmul.mubr.msk.bf16.vlgmr.msra.gmra.mxu0 %vm371_vm1, %v2554_v4  ;;  %2102 = vmatprep.subr.bf16.mxu1 %v2421_v1  ;;  %v1909_v31 = vld [vmem:[%s2877_s6] ss:$0 sm:$0xff]  ;;  %v1927_v47 = vld [vmem:[%s2877_s6 + $0x1] ss:$0 sm:$0xff]  ;;  %v1954_v55 = vld [vmem:[%s2875_s4 + $0x3] ss:$0 sm:$0xff]  ;;  %p2346_p0 = pneg %p2345_p13 }
  0x1e   : > { %2095 = vmatpush3.bf16.msra.mxu0 %v2305_v3  ;;  %2098 = vmatprep.mubr.msk.bf16.mxu0 %vm2422_vm0, %v2421_v1  ;;  %p2352_p3 = por %p2351_p2, %p2350_p1 }
  0x1f   : > { %2096 = vmatprep.subr.bf16.mxu0 %v2421_v1  ;;  %2091 = vmatmul.mubr.msk.bf16.vlgmr.msra.gmra.mxu1 %vm371_vm1, %v2554_v4 }
  0x20   : > { %2103 = vmatpush3.bf16.msra.mxu1 %v2315_v10  ;;  %2106 = vmatprep.mubr.msk.bf16.mxu1 %vm2422_vm0, %v2421_v1  ;;  %p2353_p5 = pnand %p2352_p3, %p2346_p0 }
  0x21   : > { %2104 = vmatprep.subr.bf16.mxu1 %v2421_v1 }
  0x22   : > { %2097 = vmatpush3.bf16.msra.mxu0 %v2306_v5 }
  0x23   : > { %2110 = vmatprep.subr.bf16.mxu0 %v2421_v1 }
  0x24   : > { %2105 = vmatpush3.bf16.msra.mxu1 %v2316_v11 }
  0x25   : > { %2099 = vmatmul.mubr.msk.bf16.vlgmr.msra.gmra.mxu0 %vm371_vm1, %v2554_v4  ;;  %2118 = vmatprep.subr.bf16.mxu1 %v2421_v1 }
  0x26   : > { %2111 = vmatpush3.bf16.msra.mxu0 %v2307_v8  ;;  %2114 = vmatprep.mubr.msk.bf16.mxu0 %vm2422_vm0, %v2421_v1  ;;  %v2321_v8 = vld [vmem:[%s2872_s1 + $0x18] sm:$0xff]  }
  0x27   : > { %2112 = vmatprep.subr.bf16.mxu0 %v2421_v1  ;;  %2107 = vmatmul.mubr.msk.bf16.vlgmr.msra.gmra.mxu1 %vm371_vm1, %v2554_v4 }
  0x28   : > { %2119 = vmatpush3.bf16.msra.mxu1 %v2317_v13  ;;  %2122 = vmatprep.mubr.msk.bf16.mxu1 %vm2422_vm0, %v2421_v1 }
  0x29   : > { %2120 = vmatprep.subr.bf16.mxu1 %v2421_v1 }
  0x2a   : > { %2113 = vmatpush3.bf16.msra.mxu0 %v2308_v9 }
  0x2b   : > { %2126 = vmatprep.subr.bf16.mxu0 %v2421_v1 }
  0x2c   : > { %2121 = vmatpush3.bf16.msra.mxu1 %v2318_v18 }
  0x2d   : > { %2115 = vmatmul.mubr.msk.bf16.vlgmr.msra.gmra.mxu0 %vm371_vm1, %v2554_v4  ;;  %2134 = vmatprep.subr.bf16.mxu1 %v2421_v1 }
  0x2e   : > { %2127 = vmatpush3.bf16.msra.mxu0 %v2309_v12  ;;  %2130 = vmatprep.mubr.msk.bf16.mxu0 %vm2422_vm0, %v2421_v1  ;;  %v2322_v12 = vld [vmem:[%s2872_s1 + $0x10] sm:$0xff]  }
  0x2f   : > { %2128 = vmatprep.subr.bf16.mxu0 %v2421_v1  ;;  %2123 = vmatmul.mubr.msk.bf16.vlgmr.msra.gmra.mxu1 %vm371_vm1, %v2554_v4 }
  0x30   : > { %2135 = vmatpush3.bf16.msra.mxu1 %v2319_v19  ;;  %2138 = vmatprep.mubr.msk.bf16.mxu1 %vm2422_vm0, %v2421_v1 }
  0x31   : > { %2136 = vmatprep.subr.bf16.mxu1 %v2421_v1 }
  0x32   : > { %2129 = vmatpush3.bf16.msra.mxu0 %v2310_v14 }
  0x33   : > { %2142 = vmatprep.subr.bf16.mxu0 %v2421_v1 }
  0x34   : > { %2137 = vmatpush3.bf16.msra.mxu1 %v2320_v20 }
  0x35   : > { %2131 = vmatmul.mubr.msk.bf16.vlgmr.msra.gmra.mxu0 %vm371_vm1, %v2554_v4  ;;  %2150 = vmatprep.subr.bf16.mxu1 %v2421_v1 }
  0x36   : > { %2143 = vmatpush3.bf16.msra.mxu0 %v2311_v15  ;;  %2146 = vmatprep.mubr.msk.bf16.mxu0 %vm2422_vm0, %v2421_v1  ;;  %v1945_v15 = vld [vmem:[%s2877_s6 + $0x2] ss:$0 sm:$0xff] }
  0x37   : > { %2144 = vmatprep.subr.bf16.mxu0 %v2421_v1  ;;  %2139 = vmatmul.mubr.msk.bf16.vlgmr.msra.gmra.mxu1 %vm371_vm1, %v2554_v4  ;;  %v1967_v4 = vld [vmem:[%s2873_s2] ss:$0 sm:$0xff] }
  0x38   : > { %2152 = vmatprep.mubr.msk.bf16.mxu1 %vm2422_vm0, %v2421_v1 }
  0x3a   : > { %2145 = vmatpush3.bf16.msra.mxu0 %v2312_v16 }
  0x3b   : > { %2156 = vmatprep.subr.bf16.mxu0 %v2421_v1 }
  0x3d   : > { %2147 = vmatmul.mubr.msk.bf16.vlgmr.msra.gmra.mxu0 %vm371_vm1, %v2629_v17 }
  0x3e   : > { %2158 = vmatprep.mubr.msk.bf16.mxu0 %vm2422_vm0, %v2421_v1 }
  0xdd   : > { %v409_v22 = vpop.f32.mrf.mxu0 }
  0xde   : > { %v410_v23 = vadd.f32 %v1905_v21, %v409_v22 }
  0xdf   : > { %v2084_v24 = vpop.f32.mrf.mxu0  ;;  %v472_v34 = vpop.f32.mrf.mxu1 }
  0xe0   : > { %v478_v25 = vpack.c.bf16 %v410_v23, %v410_v23  ;;  %v473_v37 = vadd.f32 %v1909_v31, %v472_v34  ;;  %v1963_v23 = vld [vmem:[%s2877_s6 + $0x3] ss:$0 sm:$0xff] }
  0xe1   : > { %v412_v26 = vpop.f32.mrf.mxu0  ;;  %v2092_v39 = vpop.f32.mrf.mxu1 }
  0xe2   : > { %480 = vst.msk [vmem:[#allocation2] sm:$0xf] %vm479_vm2, %v478_v25  ;;  %v481_v42 = vpack.c.bf16 %v473_v37, %v473_v37 }
  0xe3   : > { %v2085_v27 = vpop.f32.mrf.mxu0  ;;  %v475_v43 = vpop.f32.mrf.mxu1 }
  0xe4   : > { %482 = vst.msk [vmem:[#allocation3] sm:$0xf] %vm479_vm2, %v481_v42 }
  0xe5   : > { %v542_v29 = vpop.f32.mrf.mxu0  ;;  %v2093_v46 = vpop.f32.mrf.mxu1 }
  0xe6   : > { %v543_v30 = vadd.f32 %v1918_v28, %v542_v29 }
  0xe7   : > { %v2100_v32 = vpop.f32.mrf.mxu0  ;;  %v607_v50 = vpop.f32.mrf.mxu1 }
  0xe8   : > { %v613_v33 = vpack.c.bf16 %v543_v30, %v543_v30  ;;  %v608_v52 = vadd.f32 %v1927_v47, %v607_v50 }
  0xe9   : > { %v545_v35 = vpop.f32.mrf.mxu0  ;;  %v965_v36 = vld [vmem:[#allocation2] sm:$0xf]  ;;  %v2108_v53 = vpop.f32.mrf.mxu1 }
  0xea   : > { %615 = vst.msk [vmem:[#allocation2 + $0x4] sm:$0xf] %vm479_vm2, %v613_v33  ;;  %v972_v38 = vsel %vm967_vm3, %v965_v36, 0  ;;  %v616_v56 = vpack.c.bf16 %v608_v52, %v608_v52 }
  0xeb   : > { %v2101_v40 = vpop.f32.mrf.mxu0  ;;  %2151 = vmatpush3.bf16.xpose.msra.mxu1 %v972_v38  ;;  %v610_v57 = vpop.f32.mrf.mxu1  ;;  %v966_v58 = vld [vmem:[#allocation3] sm:$0xf] }
  0xec   : > { %2162 = vmatprep.subr.bf16.mxu1 %v2421_v1  ;;  %618 = vst.msk [vmem:[#allocation3 + $0x4] sm:$0xf] %vm479_vm2, %v616_v56  ;;  %v1034_v60 = vsel %vm1032_vm4, %v966_v58, 0 }
  0xed   : > { %v678_v44 = vpop.f32.mrf.mxu0  ;;  %v2109_v62 = vpop.f32.mrf.mxu1  ;;  %2157 = vmatpush3.bf16.msra.mxu0 %v1034_v60 }
  0xee   : > { %v679_v45 = vadd.f32 %v1936_v41, %v678_v44  ;;  %2170 = vmatprep.subr.bf16.mxu0 %v2421_v1 }
  0xef   : > { %v2116_v48 = vpop.f32.mrf.mxu0  ;;  %v743_v16 = vpop.f32.mrf.mxu1 }
  0xf0   : > { %v749_v49 = vpack.c.bf16 %v679_v45, %v679_v45  ;;  %v744_v18 = vadd.f32 %v1945_v15, %v743_v16 }
  0xf1   : > { %v681_v51 = vpop.f32.mrf.mxu0  ;;  %v2124_v19 = vpop.f32.mrf.mxu1  ;;  %v1145_v50 = vld [vmem:[#allocation2 + $0x4] sm:$0xf] }
  0xf2   : > { %751 = vst.msk [vmem:[#allocation2 + $0x8] sm:$0xf] %vm479_vm2, %v749_v49  ;;  %v752_v20 = vpack.c.bf16 %v744_v18, %v744_v18  ;;  %v1978_v49 = vld [vmem:[%s2873_s2 + $0x1] ss:$0 sm:$0xff]  ;;  %v1152_v53 = vsel %vm967_vm3, %v1145_v50, 0 }
  0xf3   : > { %v2117_v54 = vpop.f32.mrf.mxu0  ;;  %v1147_v13 = vld [vmem:[#allocation3 + $0x4] sm:$0xf]  ;;  %v746_v21 = vpop.f32.mrf.mxu1 }
  0xf4   : > { %v1213_v14 = vsel %vm1032_vm4, %v1147_v13, 0  ;;  %754 = vst.msk [vmem:[#allocation3 + $0x8] sm:$0xf] %vm479_vm2, %v752_v20  ;;  %v2323_v21 = vld [vmem:[%s2872_s1 + $0x28] sm:$0xff]  }
  0xf5   : > { %v814_v59 = vpop.f32.mrf.mxu0  ;;  %v2125_v22 = vpop.f32.mrf.mxu1 }
  0xf6   : > { %v815_v61 = vadd.f32 %v1954_v55, %v814_v59 }
  0xf7   : > { %v2132_v63 = vpop.f32.mrf.mxu0  ;;  %v879_v24 = vpop.f32.mrf.mxu1 }
  0xf8   : > { %v885_v0 = vpack.c.bf16 %v815_v61, %v815_v61  ;;  %v880_v25 = vadd.f32 %v1963_v23, %v879_v24 }
  0xf9   : > { %v817_v2 = vpop.f32.mrf.mxu0  ;;  %v2140_v26 = vpop.f32.mrf.mxu1  ;;  %v1417_v16 = vld [vmem:[#allocation2 + $0x8] sm:$0xf] }
  0xfa   : > { %887 = vst.msk [vmem:[#allocation2 + $0xc] sm:$0xf] %vm479_vm2, %v885_v0  ;;  %v888_v27 = vpack.c.bf16 %v880_v25, %v880_v25  ;;  %v1424_v19 = vsel %vm967_vm3, %v1417_v16, 0  ;;  %v2324_v25 = vld [vmem:[%s2872_s1 + $0x20] sm:$0xff]  }
  0xfb   : > { %v2133_v3 = vpop.f32.mrf.mxu0  ;;  %v882_v28 = vpop.f32.mrf.mxu1 }
  0xfc   : > { %890 = vst.msk [vmem:[#allocation3 + $0xc] sm:$0xf] %vm479_vm2, %v888_v27  ;;  %v1419_v28 = vld [vmem:[#allocation3 + $0x8] sm:$0xf] }
  0xfd   : > { %v958_v5 = vpop.f32.mrf.mxu0  ;;  %v2141_v29 = vpop.f32.mrf.mxu1 }
  0xfe   : > { %v959_v6 = vadd.f32 %v1967_v4, %v958_v5 }
  0xff   : > { %v2148_v7 = vpop.f32.mrf.mxu0 }
 0x100   : > { %v964_v9 = vpack.c.bf16 %v959_v6, %v959_v6 }
 0x101   : > { %v961_v10 = vpop.f32.mrf.mxu0 }
 0x102   : > { %2153 = vmatmul.mubr.msk.bf16.vlgmr.msra.gmra.mxu1 %vm967_vm3, %v964_v9 }
 0x103   : > { %v2149_v11 = vpop.f32.mrf.mxu0  ;;  %2163 = vmatpush3.bf16.msra.mxu1 %v2321_v8  ;;  %2166 = vmatprep.mubr.msk.bf16.mxu1 %vm2422_vm0, %v2421_v1  ;;  %v1984_v8 = vld [vmem:[%s2878_s7 + $0x4] sm:$0xf] }
 0x104   : > { %2164 = vmatprep.subr.bf16.mxu1 %v2421_v1  ;;  %v1262_v9 = vsel %vm1032_vm4, %v1984_v8, 0 }
 0x107   : > { %2165 = vmatpush3.bf16.msra.mxu1 %v2322_v12  ;;  %v1077_v12 = vld [vmem:[%s2878_s7] sm:$0xf] }
 0x108   : > { %2176 = vmatprep.subr.bf16.mxu1 %v2421_v1  ;;  %v1308_v15 = vsel %vm1032_vm4, %v1077_v12, 0 }
 0x10a   : > { %2167 = vmatmul.mubr.msk.bf16.vlgmr.msra.gmra.mxu1 %vm371_vm1, %v2629_v17 }
 0x10b   : > { %2177 = vmatpush3.bf16.msra.mxu1 %v1213_v14  ;;  %2178 = vmatprep.mubr.msk.bf16.mxu1 %vm2422_vm0, %v2421_v1 }
 0x10c   : > { %2188 = vmatprep.subr.bf16.mxu1 %v2421_v1 }
 0x1c2   : > { %v1008_v30 = vpop.f32.mrf.mxu1 }
 0x1c3   : > { %v1014_v31 = vsel %vm967_vm3, %v1008_v30, -inf }
 0x1c4   : > { %1015 = vmax.xlane.f32.xlu0 %v1014_v31  ;;  %v2154_v32 = vpop.f32.mrf.mxu1 }
 0x1c6   : > { %v1011_v33 = vpop.f32.mrf.mxu1 }
 0x1c8   : > { %v2155_v34 = vpop.f32.mrf.mxu1 }
 0x1ca   : > { %v1137_v42 = vpop.f32.mrf.mxu1 }
 0x1cb   : > { %v1138_v52 = vadd.f32 %v1978_v49, %v1137_v42 }
 0x1cc   : > { %v2168_v43 = vpop.f32.mrf.mxu1 }
 0x1cd   : > { %v1143_v54 = vpack.c.bf16 %v1138_v52, %v1138_v52 }
 0x1ce   : > { %v1140_v44 = vpop.f32.mrf.mxu1 }
 0x1d0   : > { %v2169_v45 = vpop.f32.mrf.mxu1 }
 0x24d   : > { %v1016_v35 = vpop.xlane.xlu0 %1015 }
 0x24e   : > { %v1017_v36 = vsub.f32 %v1008_v30, %v1016_v35  ;;  %v1485_v30 = vsel %vm1032_vm4, %v1419_v28, 0 }
 0x250   : > { %v1018_v37 = vpack.c.bf16 %v1017_v36, %v1017_v36 }
 0x252   : > { %v1020_v38 = vmul.bf16 1069105081, %v1018_v37  ;;  %v1992_v37 = vld [vmem:[%s2873_s2 + $0x2] ss:$0 sm:$0xff] }
 0x254   : > { %2327 = vpow.bf16 %v1020_v38 }
 0x262   : > { %v2328_v39 = vpop.eup %2327 }
 0x263   : > { %v1022_v40 = vunpack.c.l.bf16 %v2328_v39 }
 0x265   : > { %v1023_v41 = vsel %vm967_vm3, %v1022_v40, 0.0 }
 0x266   : > { %1024 = vadd.xlane.f32.xlu0 %v1023_v41 }
 0x2ef   : > { %v1025_v46 = vpop.xlane.xlu0 %1024 }
 0x2f0   : > { %2329 = vrcp.f32 %v1025_v46 }
 0x2fd   : > { %v2330_v47 = vpop.eup %2329 }
 0x2fe   : > { %v1027_v48 = vpack.c.bf16 %v2330_v47, %v2330_v47 }
 0x300   : > { %v1028_v51 = vmul.bf16 %v2328_v39, %v1027_v48 }
 0x302   : > { %2159 = vmatmul.mubr.msk.bf16.vlgmr.msra.gmra.mxu0 %vm967_vm3, %v1028_v51 }
 0x303   : > { %2171 = vmatpush3.bf16.xpose.msra.mxu0 %v1152_v53  ;;  %2172 = vmatprep.mubr.msk.bf16.mxu0 %vm2422_vm0, %v2421_v1 }
 0x304   : > { %2182 = vmatprep.subr.bf16.mxu0 %v2421_v1 }
 0x30a   : > { %2173 = vmatmul.mubr.msk.bf16.vlgmr.msra.gmra.mxu0 %vm967_vm3, %v1143_v54 }
 0x30b   : > { %2184 = vmatprep.mubr.msk.bf16.mxu0 %vm2422_vm0, %v2421_v1  ;;  %2183 = vmatpush3.bf16.msra.mxu0 %v1262_v9  ;;  %v2005_v9 = vld [vmem:[%s2873_s2 + $0x3] ss:$0 sm:$0xff] }
 0x30c   : > { %2194 = vmatprep.subr.bf16.mxu0 %v2421_v1 }
 0x3c2   : > { %v1070_v55 = vpop.f32.mrf.mxu0 }
 0x3c3   : > { %v1076_v18 = vpack.c.bf16 %v1070_v55, %v1070_v55 }
 0x3c4   : > { %v2160_v56 = vpop.f32.mrf.mxu0 }
 0x3c5   : > { %v1998_v56 = vld [vmem:[%s2878_s7 + $0x8] sm:$0xf] }
 0x3c6   : > { %v1073_v57 = vpop.f32.mrf.mxu0 }
 0x3c7   : > { %v1534_v57 = vsel %vm1032_vm4, %v1998_v56, 0 }
 0x3c8   : > { %v2161_v58 = vpop.f32.mrf.mxu0 }
 0x3ca   : > { %v1188_v59 = vpop.f32.mrf.mxu0 }
 0x3cb   : > { %v1194_v60 = vsel %vm967_vm3, %v1188_v59, -inf }
 0x3cc   : > { %1195 = vmax.xlane.f32.xlu1 %v1194_v60  ;;  %v2174_v61 = vpop.f32.mrf.mxu0 }
 0x3cd   : > { %v2325_v61 = vld [vmem:[%s2872_s1 + $0x38] sm:$0xff]  }
 0x3ce   : > { %v1191_v62 = vpop.f32.mrf.mxu0 }
 0x3d0   : > { %v2175_v63 = vpop.f32.mrf.mxu0 }
 0x3d1   : > { %v2326_v63 = vld [vmem:[%s2872_s1 + $0x30] sm:$0xff]  }
 0x455   : > { %v1196_v0 = vpop.xlane.xlu1 %1195 }
 0x456   : > { %v1197_v2 = vsub.f32 %v1188_v59, %v1196_v0  ;;  %v1646_v0 = vld [vmem:[#allocation3 + $0xc] sm:$0xf] }
 0x458   : > { %v1198_v3 = vpack.c.bf16 %v1197_v2, %v1197_v2  ;;  %v1712_v2 = vsel %vm1032_vm4, %v1646_v0, 0 }
 0x45a   : > { %v1200_v4 = vmul.bf16 1069105081, %v1198_v3 }
 0x45c   : > { %2331 = vpow.bf16 %v1200_v4  ;;  %v1644_v4 = vld [vmem:[#allocation2 + $0xc] sm:$0xf] }
 0x46a   : > { %v2332_v5 = vpop.eup %2331 }
 0x46b   : > { %v1202_v6 = vunpack.c.l.bf16 %v2332_v5 }
 0x46d   : > { %v1203_v7 = vsel %vm967_vm3, %v1202_v6, 0.0 }
 0x46e   : > { %1204 = vadd.xlane.f32.xlu1 %v1203_v7  ;;  %v1651_v7 = vsel %vm967_vm3, %v1644_v4, 0 }
 0x4f7   : > { %v1205_v10 = vpop.xlane.xlu1 %1204 }
 0x4f8   : > { %2333 = vrcp.f32 %v1205_v10 }
 0x505   : > { %v2334_v11 = vpop.eup %2333 }
 0x506   : > { %v1207_v13 = vpack.c.bf16 %v2334_v11, %v2334_v11 }
 0x508   : > { %v1208_v14 = vmul.bf16 %v2332_v5, %v1207_v13 }
 0x50a   : > { %2179 = vmatmul.mubr.msk.bf16.vlgmr.msra.gmra.mxu1 %vm967_vm3, %v1208_v14 }
 0x50b   : > { %2189 = vmatpush3.bf16.msra.mxu1 %v1308_v15  ;;  %2190 = vmatprep.mubr.msk.bf16.mxu1 %vm2422_vm0, %v2421_v1 }
 0x50c   : > { %2202 = vmatprep.subr.bf16.mxu1 %v2421_v1 }
 0x512   : > { %2191 = vmatmul.mubr.msk.bf16.vlgmr.msra.gmra.mxu1 %vm967_vm3, %v1076_v18 }
 0x513   : > { %2203 = vmatpush3.bf16.xpose.msra.mxu1 %v1424_v19  ;;  %2204 = vmatprep.mubr.msk.bf16.mxu1 %vm2422_vm0, %v2421_v1 }
 0x514   : > { %2214 = vmatprep.subr.bf16.mxu1 %v2421_v1 }
 0x5ca   : > { %v1249_v20 = vpop.f32.mrf.mxu1 }
 0x5cb   : > { %v1255_v22 = vpack.c.bf16 %v1249_v20, %v1249_v20 }
 0x5cc   : > { %v2180_v23 = vpop.f32.mrf.mxu1 }
 0x5cd   : > { %2185 = vmatmul.mubr.msk.bf16.vlgmr.msra.gmra.mxu0 %vm967_vm3, %v1255_v22 }
 0x5ce   : > { %2195 = vmatpush3.bf16.msra.mxu0 %v2323_v21  ;;  %v1252_v24 = vpop.f32.mrf.mxu1  ;;  %2198 = vmatprep.mubr.msk.bf16.mxu0 %vm2422_vm0, %v2421_v1 }
 0x5cf   : > { %2196 = vmatprep.subr.bf16.mxu0 %v2421_v1 }
 0x5d0   : > { %v2181_v26 = vpop.f32.mrf.mxu1 }
 0x5d2   : > { %2197 = vmatpush3.bf16.msra.mxu0 %v2324_v25  ;;  %v2755_v27 = vpop.f32.mrf.mxu1 }
 0x5d3   : > { %2208 = vmatprep.subr.bf16.mxu0 %v2421_v1 }
 0x5d4   : > { %v2192_v29 = vpop.f32.mrf.mxu1 }
 0x5d5   : > { %2199 = vmatmul.mubr.msk.bf16.vlgmr.msra.gmra.mxu0 %vm371_vm1, %v2629_v17 }
 0x5d6   : > { %2209 = vmatpush3.bf16.msra.mxu0 %v1485_v30  ;;  %v1347_v31 = vpop.f32.mrf.mxu1  ;;  %2210 = vmatprep.mubr.msk.bf16.mxu0 %vm2422_vm0, %v2421_v1 }
 0x5d7   : > { %2220 = vmatprep.subr.bf16.mxu0 %v2421_v1 }
 0x5d8   : > { %v2193_v32 = vpop.f32.mrf.mxu1 }
 0x68d   : > { %v2764_v33 = vpop.f32.mrf.mxu0 }
 0x68e   : > { %v1345_v16 = vadd.f32 %v2755_v27, %v2764_v33  ;;  %v2011_v33 = vld [vmem:[%s2878_s7 + $0xc] sm:$0xf] }
 0x68f   : > { %v2186_v34 = vpop.f32.mrf.mxu0 }
 0x691   : > { %v1301_v35 = vpop.f32.mrf.mxu0 }
 0x692   : > { %v1761_v35 = vsel %vm1032_vm4, %v2011_v33, 0 }
 0x693   : > { %v2187_v36 = vpop.f32.mrf.mxu0 }
 0x695   : > { %v1409_v38 = vpop.f32.mrf.mxu0 }
 0x696   : > { %v1410_v39 = vadd.f32 %v1992_v37, %v1409_v38 }
 0x697   : > { %v2200_v40 = vpop.f32.mrf.mxu0 }
 0x698   : > { %v1415_v41 = vpack.c.bf16 %v1410_v39, %v1410_v39 }
 0x699   : > { %v1412_v42 = vpop.f32.mrf.mxu0 }
 0x69a   : > { %2205 = vmatmul.mubr.msk.bf16.vlgmr.msra.gmra.mxu1 %vm967_vm3, %v1415_v41 }
 0x69b   : > { %v2201_v43 = vpop.f32.mrf.mxu0  ;;  %2216 = vmatprep.mubr.msk.bf16.mxu1 %vm2422_vm0, %v2421_v1  ;;  %2215 = vmatpush3.bf16.msra.mxu1 %v1534_v57 }
 0x69c   : > { %2228 = vmatprep.subr.bf16.mxu1 %v2421_v1 }
 0x75a   : > { %v1460_v44 = vpop.f32.mrf.mxu1 }
 0x75b   : > { %v1466_v45 = vsel %vm967_vm3, %v1460_v44, -inf }
 0x75c   : > { %1467 = vmax.xlane.f32.xlu0 %v1466_v45  ;;  %v2206_v46 = vpop.f32.mrf.mxu1 }
 0x75d   : > { %v2013_v46 = vld [vmem:[%s2879_s8] ss:$0 sm:$0xff] }
 0x75e   : > { %v1463_v47 = vpop.f32.mrf.mxu1 }
 0x760   : > { %v2207_v48 = vpop.f32.mrf.mxu1 }
 0x7e5   : > { %v1468_v49 = vpop.xlane.xlu0 %1467 }
 0x7e6   : > { %v1469_v50 = vsub.f32 %v1460_v44, %v1468_v49 }
 0x7e8   : > { %v1470_v51 = vpack.c.bf16 %v1469_v50, %v1469_v50 }
 0x7ea   : > { %v1472_v52 = vmul.bf16 1069105081, %v1470_v51 }
 0x7ec   : > { %2335 = vpow.bf16 %v1472_v52 }
 0x7fa   : > { %v2336_v53 = vpop.eup %2335 }
 0x7fb   : > { %v1474_v54 = vunpack.c.l.bf16 %v2336_v53 }
 0x7fd   : > { %v1475_v55 = vsel %vm967_vm3, %v1474_v54, 0.0 }
 0x7fe   : > { %1476 = vadd.xlane.f32.xlu1 %v1475_v55 }
 0x887   : > { %v1477_v58 = vpop.xlane.xlu1 %1476 }
 0x888   : > { %2337 = vrcp.f32 %v1477_v58 }
 0x895   : > { %v2338_v59 = vpop.eup %2337 }
 0x896   : > { %v1479_v60 = vpack.c.bf16 %v2338_v59, %v2338_v59 }
 0x898   : > { %v1480_v62 = vmul.bf16 %v2336_v53, %v1479_v60 }
 0x89a   : > { %2211 = vmatmul.mubr.msk.bf16.vlgmr.msra.gmra.mxu0 %vm967_vm3, %v1480_v62 }
 0x89b   : > { %2221 = vmatpush3.bf16.msra.mxu0 %v2325_v61  ;;  %2224 = vmatprep.mubr.msk.bf16.mxu0 %vm2422_vm0, %v2421_v1 }
 0x89c   : > { %2222 = vmatprep.subr.bf16.mxu0 %v2421_v1 }
 0x89f   : > { %2223 = vmatpush3.bf16.msra.mxu0 %v2326_v63 }
 0x8a0   : > { %2234 = vmatprep.subr.bf16.mxu0 %v2421_v1 }
 0x8a2   : > { %2225 = vmatmul.mubr.msk.bf16.vlgmr.msra.gmra.mxu0 %vm371_vm1, %v2629_v17 }
 0x8a3   : > { %2235 = vmatpush3.bf16.msra.mxu0 %v1712_v2  ;;  %2236 = vmatprep.mubr.msk.bf16.mxu0 %vm2422_vm0, %v2421_v1 }
 0x95a   : > { %v1521_v3 = vpop.f32.mrf.mxu0 }
 0x95b   : > { %v1527_v5 = vpack.c.bf16 %v1521_v3, %v1521_v3 }
 0x95c   : > { %v2212_v6 = vpop.f32.mrf.mxu0 }
 0x95d   : > { %2217 = vmatmul.mubr.msk.bf16.vlgmr.msra.gmra.mxu1 %vm967_vm3, %v1527_v5 }
 0x95e   : > { %2229 = vmatpush3.bf16.xpose.msra.mxu1 %v1651_v7  ;;  %v1524_v8 = vpop.f32.mrf.mxu0  ;;  %2230 = vmatprep.mubr.msk.bf16.mxu1 %vm2422_vm0, %v2421_v1 }
 0x95f   : > { %2240 = vmatprep.subr.bf16.mxu1 %v2421_v1 }
 0x960   : > { %v2213_v17 = vpop.f32.mrf.mxu0 }
 0x962   : > { %v1636_v10 = vpop.f32.mrf.mxu0 }
 0x963   : > { %v1637_v11 = vadd.f32 %v2005_v9, %v1636_v10 }
 0x964   : > { %v2226_v12 = vpop.f32.mrf.mxu0 }
 0x965   : > { %v1642_v13 = vpack.c.bf16 %v1637_v11, %v1637_v11 }
 0x966   : > { %v1639_v14 = vpop.f32.mrf.mxu0 }
 0x967   : > { %2231 = vmatmul.mubr.msk.bf16.vlgmr.msra.gmra.mxu1 %vm967_vm3, %v1642_v13 }
 0x968   : > { %v2227_v15 = vpop.f32.mrf.mxu0  ;;  %2242 = vmatprep.mubr.msk.bf16.mxu1 %vm2422_vm0, %v2421_v1  ;;  %2241 = vmatpush3.bf16.msra.mxu1 %v1761_v35 }
 0xa1d   : > { %v1570_v18 = vpop.f32.mrf.mxu1 }
 0xa1e   : > { %v1576_v19 = vadd.f32 %v1570_v18, %v1345_v16 }
 0xa1f   : > { %v2218_v20 = vpop.f32.mrf.mxu1 }
 0xa21   : > { %v1573_v21 = vpop.f32.mrf.mxu1 }
 0xa23   : > { %v2219_v22 = vpop.f32.mrf.mxu1 }
 0xa27   : > { %v1687_v23 = vpop.f32.mrf.mxu1 }
 0xa28   : > { %v1693_v24 = vsel %vm967_vm3, %v1687_v23, -inf }
 0xa29   : > { %1694 = vmax.xlane.f32.xlu0 %v1693_v24  ;;  %v2232_v25 = vpop.f32.mrf.mxu1 }
 0xa2b   : > { %v1690_v26 = vpop.f32.mrf.mxu1 }
 0xa2d   : > { %v2233_v28 = vpop.f32.mrf.mxu1 }
 0xab2   : > { %v1695_v29 = vpop.xlane.xlu0 %1694 }
 0xab3   : > { %v1696_v30 = vsub.f32 %v1687_v23, %v1695_v29 }
 0xab5   : > { %v1697_v31 = vpack.c.bf16 %v1696_v30, %v1696_v30 }
 0xab7   : > { %v1699_v32 = vmul.bf16 1069105081, %v1697_v31 }
 0xab9   : > { %2339 = vpow.bf16 %v1699_v32 }
 0xac7   : > { %v2340_v1 = vpop.eup %2339 }
 0xac8   : > { %v1701_v34 = vunpack.c.l.bf16 %v2340_v1 }
 0xaca   : > { %v1702_v27 = vsel %vm967_vm3, %v1701_v34, 0.0 }
 0xacb   : > { %1703 = vadd.xlane.f32.xlu1 %v1702_v27 }
 0xb54   : > { %v1704_v36 = vpop.xlane.xlu1 %1703 }
 0xb55   : > { %2341 = vrcp.f32 %v1704_v36 }
 0xb62   : > { %v2342_v37 = vpop.eup %2341 }
 0xb63   : > { %v1706_v38 = vpack.c.bf16 %v2342_v37, %v2342_v37 }
 0xb65   : > { %v1707_v39 = vmul.bf16 %v2340_v1, %v1706_v38 }
 0xb67   : > { %2237 = vmatmul.mubr.msk.bf16.vlgmr.msra.gmra.mxu0 %vm967_vm3, %v1707_v39 }
 0xc27   : > { %v1748_v40 = vpop.f32.mrf.mxu0 }
 0xc28   : > { %v1754_v41 = vpack.c.bf16 %v1748_v40, %v1748_v40 }
 0xc29   : > { %v2238_v42 = vpop.f32.mrf.mxu0 }
 0xc2a   : > { %2243 = vmatmul.mubr.msk.bf16.vlgmr.msra.gmra.mxu1 %vm967_vm3, %v1754_v41 }
 0xc2b   : > { %v1751_v43 = vpop.f32.mrf.mxu0 }
 0xc2d   : > { %v2239_v44 = vpop.f32.mrf.mxu0 }
 0xcea   : > { %v1797_v45 = vpop.f32.mrf.mxu1 }
 0xceb   : > { %v1803_v47 = vadd.f32 %v1797_v45, %v1576_v19 }
 0xcec   : > { %v2244_v48 = vpop.f32.mrf.mxu1 }
 0xced   : > { %v1811_v49 = vadd.f32 %v2013_v46, %v1803_v47 }
 0xcee   : > { %v1800_v50 = vpop.f32.mrf.mxu1 }
 0xcef   : > { %1812 = vst.msk [vmem:[%s337_s27] sm:$0xff] %vm371_vm1, %v1811_v49 }
 0xcf0   : > { %v2245_v51 = vpop.f32.mrf.mxu1 }
 0xcf1   : > { %2356 = shalt.err (!%p2353_p5)
}
 0xcf2   : > { %s2357_s26 = scalar_lea.hbm %s2824_s20, 128  ;;  %s2361_s29 = scalar_lea.hbm %s2880_s9, 256 }
 0xcf3   : > { %p2358_p6 = scmp.ne.s32.totalorder %s2824_s20, %s2357_s26  ;;  %p2362_p10 = scmp.lt.s32.totalorder %s2824_s20, %s2880_s9 }
 0xcf4   : > { %p2363_p11 = scmp.lt.s32.totalorder %s2361_s29, %s2357_s26 }
 0xcf5   : > { %p2359_p7 = pnand %p2358_p6, %p2514_p4 }
 0xcf6   : > { %p2364_p12 = por %p2363_p11, %p2362_p10 }
 0xcf7   : > { %p2360_p9 = pneg %p2359_p7 }
 0xcf9   : > { %p2365_p13 = pnand %p2364_p12, %p2360_p9 }
 0xcfb   : > { %2368 = shalt.err (!%p2365_p13)
}
 0xcfc   : > { %2246 = dma.vmem_to_hbm [thread:$0]  (%p2514_p4), %s2826_s28, 128, %s2824_s20, %s1814_s12  }
 0xcfd PF: > { %p2252_p0 = scmp.ge.s32.totalorder %s2419_s14, 2  ;;  %s1840_s16 = sand.u32 1, %s2399_s30  }
 0xcfe   : > { %s1841_s24 = scalar_lea.sflag [#allocation5], %s1840_s16 }
 0xcff   : > { %p2249_p1 = pnand %p2252_p0, %p2521_p8 }
 0xd01   : > { %p2250_p2 = pneg %p2249_p1 }
 0xd03   : > { %2394 = dma.done.wait (%p2250_p2), %s1841_s24, 128  }
 0xd04   : > { %2396 = vsyncadd (%p2250_p2), %s1841_s24, 4294967168  ;;  %s22_s14 = sadd.s32 1, %s2419_s14   ;;  %s2883_s30 = smov %s2403_s10 }
 0xd05   : > { %p19_p3 = scmp.ge.s32.totalorder %s22_s14, 4   ;;  %s2884_s10 = smov %s2407_s11 }
 0xd06   : > { %s2885_s11 = smov %s2527_s22  ;;  %s2886_s12 = smov %s2415_s13 }
 0xd07   : > { %s2887_s13 = smov %s2889_s17  ;;  %21 = sbr.rel (!%p19_p3) target bundleno = 4 (0x4), region = 129 }
 0xd0c   :  { %1846 = vsyncpa [#allocation5], 1 }
 0xd0d   :  { %1848 = vsyncpa [#allocation5 + $0x1], 1 }

</bundles_post_ra>
